<compile_context>
chip_gen: v7x
topology: tpu7x:2x2x1
jax: 0.10.0
libtpu: 0.0.40
codegen_flags: <defaults>
</compile_context>

<pallas_src>
import jax
import jax.numpy as jnp
from jax import lax
from jax.experimental import pallas as pl
from jax.experimental.pallas import tpu as pltpu

_ISSUE_UNROLL = 8  # static unroll factor for the DMA issue / wait loops


def _embedding_gather_kernel(ids_ref, emb_hbm, pos_ref, out_ref, row_buf, sem):
    # ids_ref : (B*S,) int32 in SMEM (scalar prefetch)
    # emb_hbm : (V, D)  f32 ref left in HBM (pl.ANY)
    # pos_ref : (tile_s, D) f32 positional-encoding tile in VMEM
    #           (block index depends only on the OUTER grid axis -> fetched once per seq tile)
    # out_ref : (1, tile_s, D) f32 output tile
    # row_buf : (2, tile_s, D) f32 VMEM double buffer for the gathered rows
    # sem     : (2,) DMA semaphores (one per buffer slot; all row copies have identical size)
    si = pl.program_id(0)            # seq tile  (outer, "parallel")
    b = pl.program_id(1)             # batch row (inner, "arbitrary" -> strictly sequential)
    n_s_tiles = pl.num_programs(0)
    num_b = pl.num_programs(1)
    tile_s = row_buf.shape[1]
    vocab = emb_hbm.shape[0]

    def issue_rows(batch_idx, slot):
        # Flattened token index of row t inside this (batch row, seq tile).
        base = (batch_idx * n_s_tiles + si) * tile_s

        def body(t, carry):
            tok = jnp.clip(ids_ref[base + t], 0, vocab - 1)  # PyTorch raises on OOB; we clamp
            pltpu.make_async_copy(
                emb_hbm.at[pl.ds(tok, 1), :],
                row_buf.at[slot, pl.ds(t, 1), :],
                sem.at[slot],
            ).start()
            return carry

        lax.fori_loop(0, tile_s, body, 0, unroll=_ISSUE_UNROLL)

    slot = lax.rem(b, 2)

    # First inner step of every seq tile primes slot 0 with its own rows.
    @pl.when(b == 0)
    def _():
        issue_rows(0, 0)

    # Cross-step prefetch: issue the NEXT batch row's gather (its ids are already in SMEM)
    # before waiting on the current slot, keeping the row-gather DMA queue full across steps.
    # All scalar (SMEM) reads happen here, BEFORE any .wait().
    @pl.when(b + 1 < num_b)
    def _():
        issue_rows(b + 1, lax.rem(b + 1, 2))

    # Wait for this step's tile_s row copies.  Every copy has identical size, so wait on a
    # fixed-shape dummy descriptor (no SMEM id re-read / clip in the wait path).
    def wait_body(t, carry):
        pltpu.make_async_copy(
            emb_hbm.at[pl.ds(0, 1), :],
            row_buf.at[slot, pl.ds(0, 1), :],
            sem.at[slot],
        ).wait()
        return carry

    lax.fori_loop(0, tile_s, wait_body, 0, unroll=_ISSUE_UNROLL)

    # Fused broadcasted positional-encoding add; dropout == identity (eval mode).
    out_ref[0] = row_buf[slot] + pos_ref[...]


def _pick_tile_s(seq_len, d_model):
    # Large seq tiles amortize the ~0.35 us per-grid-step overhead and keep many row DMAs in
    # flight, but cap at 512 rows so at most ~2*tile_s tiny descriptors are outstanding on the
    # double-buffered semaphore pair.
    del d_model
    tile_s = None
    for cand in (512, 256, 128, 64, 32, 16, 8):
        if cand <= seq_len and seq_len % cand == 0:
            tile_s = cand
            break
    if tile_s is None:
        return seq_len  # full-extent block is always legal
    # Prefer >= 2 seq tiles when the shape allows it: the OUTER grid axis is the one megacore
    # shards across TensorCores on v7x.
    if tile_s == seq_len and seq_len % 16 == 0:
        tile_s = seq_len // 2
    return tile_s


def transformer_embedding(ids, emb_table, pos_enc_full, *, tile_s=None):
    """ids: (B, S) int32; emb_table: (V, D) f32; pos_enc_full: (max_len, D) f32."""
    B, S = ids.shape
    V, D = emb_table.shape
    pos_enc = pos_enc_full[:S, :]  # glue: PositionalEncoding.forward slices to seq_len

    if tile_s is None:
        tile_s = _pick_tile_s(S, D)
    assert S % tile_s == 0
    n_s_tiles = S // tile_s

    ids_flat = ids.reshape(B * S).astype(jnp.int32)

    # Memory-bound kernel: almost no FLOPs; HBM row gather + output writeback dominate.
    # pos_enc is fetched once per seq tile (its block index is constant across the inner
    # batch axis), i.e. S*D*4 bytes total — NOT B times.
    bytes_accessed = (B * S * 4            # token ids (SMEM prefetch)
                      + B * S * D * 4      # gathered embedding rows
                      + S * D * 4          # positional encoding (once)
                      + B * S * D * 4)     # output writeback
    cost = pl.CostEstimate(flops=B * S * D, transcendentals=0,
                           bytes_accessed=bytes_accessed)

    return pl.pallas_call(
        _embedding_gather_kernel,
        out_shape=jax.ShapeDtypeStruct((B, S, D), jnp.float32),
        grid_spec=pltpu.PrefetchScalarGridSpec(
            num_scalar_prefetch=1,
            grid=(n_s_tiles, B),           # seq tiles OUTER (parallel), batch rows INNER
            in_specs=[
                pl.BlockSpec(memory_space=pl.ANY),                       # emb table stays in HBM
                pl.BlockSpec((tile_s, D), lambda si, b, ids: (si, 0)),   # pos tile: const over b
            ],
            out_specs=pl.BlockSpec((1, tile_s, D), lambda si, b, ids: (b, si, 0)),
            scratch_shapes=[
                pltpu.VMEM((2, tile_s, D), jnp.float32),   # double-buffered gather landing zone
                pltpu.SemaphoreType.DMA((2,)),
            ],
        ),
        compiler_params=pltpu.CompilerParams(
            dimension_semantics=("parallel", "arbitrary"),
        ),
        cost_estimate=cost,
    )(ids_flat, emb_table, pos_enc)


def make_positional_encoding(d_model, max_len):
    pos = jnp.arange(max_len, dtype=jnp.float32)[:, None]               # (max_len, 1)
    _2i = jnp.arange(0, d_model, 2, dtype=jnp.float32)                  # (d_model/2,)
    angle = pos / (10000.0 ** (_2i / d_model))                          # (max_len, d_model/2)
    enc = jnp.zeros((max_len, d_model), dtype=jnp.float32)
    enc = enc.at[:, 0::2].set(jnp.sin(angle))
    enc = enc.at[:, 1::2].set(jnp.cos(angle))
    return enc


if __name__ == "__main__":
    # Small deterministic configuration (D = 128 so the output tile is lane-dense).
    vocab_size = 32
    d_model = 128
    max_len = 32
    batch = 2
    seq = 16
    # drop_prob is unused at inference (dropout == identity)

    key = jax.random.PRNGKey(0)
    k_emb, k_ids = jax.random.split(key)

    # nn.Embedding(vocab_size, d_model, padding_idx=1): normal init, row 1 zeroed.
    emb_table = jax.random.normal(k_emb, (vocab_size, d_model), dtype=jnp.float32)
    emb_table = emb_table.at[1, :].set(0.0)

    pos_enc_full = make_positional_encoding(d_model, max_len)

    ids = jax.random.randint(k_ids, (batch, seq), 0, vocab_size, dtype=jnp.int32)

    out = transformer_embedding(ids, emb_table, pos_enc_full)
    out = jax.block_until_ready(out)

    # Pure-JAX reference check (tok_emb gather + pos enc broadcast add).
    ref = jnp.take(emb_table, ids, axis=0) + pos_enc_full[:seq, :][None, :, :]
    assert out.shape == (batch, seq, d_model)
    assert jnp.allclose(out, ref, atol=1e-5, rtol=1e-5)

    print("KERNEL_OK")
</pallas_src>

<mosaic_0001>
module attributes {stable_mosaic.version = 11 : i64} {
  func.func @_embedding_gather_kernel(%arg0: i32, %arg1: i32, %arg2: memref<32xi32, #tpu.memory_space<smem>>, %arg3: memref<32x128xf32, #tpu.memory_space<any>>, %arg4: memref<8x128xf32, #tpu.memory_space<vmem>>, %arg5: memref<1x8x128xf32, #tpu.memory_space<vmem>>, %arg6: memref<2x8x128xf32, #tpu.memory_space<vmem>>, %arg7: memref<2x!tpu.dma_semaphore, #tpu.memory_space<semaphore_mem>>) attributes {dimension_semantics = [#tpu.dimension_semantics<parallel>, #tpu.dimension_semantics<arbitrary>], iteration_bounds = array<i64: 2, 2>, scalar_prefetch = 1 : i64, scratch_operands = 2 : i64, tpu.core_type = #tpu.core_type<tc>, window_params = [{}, {transform_indices = @transform_1, window_bounds = array<i64: 8, 128>}, {transform_indices = @transform_2, window_bounds = array<i64: 1, 8, 128>}]} {
    %c2_i32 = arith.constant 2 : i32
    %0 = arith.remsi %arg1, %c2_i32 : i32
    %c0_i32 = arith.constant 0 : i32
    %1 = arith.cmpi eq, %arg1, %c0_i32 : i32
    %2 = arith.extui %1 : i1 to i32
    %c0_i32_0 = arith.constant 0 : i32
    %3 = arith.cmpi ne, %2, %c0_i32_0 : i32
    scf.if %3 {
      %c0_i32_44 = arith.constant 0 : i32
      %56 = arith.addi %c0_i32_44, %arg0 : i32
      %c8_i32 = arith.constant 8 : i32
      %57 = arith.muli %56, %c8_i32 : i32
      %c0_i32_45 = arith.constant 0 : i32
      %58 = arith.addi %57, %c0_i32_45 : i32
      %59 = arith.index_cast %58 : i32 to index
      %60 = memref.load %arg2[%59] : memref<32xi32, #tpu.memory_space<smem>>
      %c0_i32_46 = arith.constant 0 : i32
      %c31_i32 = arith.constant 31 : i32
      %61 = arith.maxsi %c0_i32_46, %60 : i32
      %62 = arith.minsi %c31_i32, %61 : i32
      %c0_i32_47 = arith.constant 0 : i32
      %c0_i32_48 = arith.constant 0 : i32
      %c0_i32_49 = arith.constant 0 : i32
      %63 = tpu.memref_slice %arg3[%62, %c0_i32_49] : memref<32x128xf32, #tpu.memory_space<any>> -> memref<1x128xf32, #tpu.memory_space<any>>
      %c0_i32_50 = arith.constant 0 : i32
      %64 = tpu.memref_slice %arg6[%c0_i32_47, %c0_i32_45, %c0_i32_50] : memref<2x8x128xf32, #tpu.memory_space<vmem>> -> memref<1x1x128xf32, #tpu.memory_space<vmem>>
      %65 = tpu.memref_squeeze %64 : memref<1x1x128xf32, #tpu.memory_space<vmem>> -> memref<1x128xf32, #tpu.memory_space<vmem>>
      %66 = tpu.memref_slice %arg7[%c0_i32_48] : memref<2x!tpu.dma_semaphore, #tpu.memory_space<semaphore_mem>> -> memref<1x!tpu.dma_semaphore, #tpu.memory_space<semaphore_mem>>
      %67 = tpu.memref_squeeze %66 : memref<1x!tpu.dma_semaphore, #tpu.memory_space<semaphore_mem>> -> memref<!tpu.dma_semaphore, #tpu.memory_space<semaphore_mem>>
      tpu.enqueue_dma source(%63 : memref<1x128xf32, #tpu.memory_space<any>>) target(%65 : memref<1x128xf32, #tpu.memory_space<vmem>>) target_semaphore(%67 : memref<!tpu.dma_semaphore, #tpu.memory_space<semaphore_mem>>)
      %c1_i32_51 = arith.constant 1 : i32
      %68 = arith.addi %57, %c1_i32_51 : i32
      %69 = arith.index_cast %68 : i32 to index
      %70 = memref.load %arg2[%69] : memref<32xi32, #tpu.memory_space<smem>>
      %c0_i32_52 = arith.constant 0 : i32
      %c31_i32_53 = arith.constant 31 : i32
      %71 = arith.maxsi %c0_i32_52, %70 : i32
      %72 = arith.minsi %c31_i32_53, %71 : i32
      %c0_i32_54 = arith.constant 0 : i32
      %c0_i32_55 = arith.constant 0 : i32
      %c0_i32_56 = arith.constant 0 : i32
      %73 = tpu.memref_slice %arg3[%72, %c0_i32_56] : memref<32x128xf32, #tpu.memory_space<any>> -> memref<1x128xf32, #tpu.memory_space<any>>
      %c0_i32_57 = arith.constant 0 : i32
      %74 = tpu.memref_slice %arg6[%c0_i32_54, %c1_i32_51, %c0_i32_57] : memref<2x8x128xf32, #tpu.memory_space<vmem>> -> memref<1x1x128xf32, #tpu.memory_space<vmem>>
      %75 = tpu.memref_squeeze %74 : memref<1x1x128xf32, #tpu.memory_space<vmem>> -> memref<1x128xf32, #tpu.memory_space<vmem>>
      %76 = tpu.memref_slice %arg7[%c0_i32_55] : memref<2x!tpu.dma_semaphore, #tpu.memory_space<semaphore_mem>> -> memref<1x!tpu.dma_semaphore, #tpu.memory_space<semaphore_mem>>
      %77 = tpu.memref_squeeze %76 : memref<1x!tpu.dma_semaphore, #tpu.memory_space<semaphore_mem>> -> memref<!tpu.dma_semaphore, #tpu.memory_space<semaphore_mem>>
      tpu.enqueue_dma source(%73 : memref<1x128xf32, #tpu.memory_space<any>>) target(%75 : memref<1x128xf32, #tpu.memory_space<vmem>>) target_semaphore(%77 : memref<!tpu.dma_semaphore, #tpu.memory_space<semaphore_mem>>)
      %c2_i32_58 = arith.constant 2 : i32
      %78 = arith.addi %57, %c2_i32_58 : i32
      %79 = arith.index_cast %78 : i32 to index
      %80 = memref.load %arg2[%79] : memref<32xi32, #tpu.memory_space<smem>>
      %c0_i32_59 = arith.constant 0 : i32
      %c31_i32_60 = arith.constant 31 : i32
      %81 = arith.maxsi %c0_i32_59, %80 : i32
      %82 = arith.minsi %c31_i32_60, %81 : i32
      %c0_i32_61 = arith.constant 0 : i32
      %c0_i32_62 = arith.constant 0 : i32
      %c0_i32_63 = arith.constant 0 : i32
      %83 = tpu.memref_slice %arg3[%82, %c0_i32_63] : memref<32x128xf32, #tpu.memory_space<any>> -> memref<1x128xf32, #tpu.memory_space<any>>
      %c0_i32_64 = arith.constant 0 : i32
      %84 = tpu.memref_slice %arg6[%c0_i32_61, %c2_i32_58, %c0_i32_64] : memref<2x8x128xf32, #tpu.memory_space<vmem>> -> memref<1x1x128xf32, #tpu.memory_space<vmem>>
      %85 = tpu.memref_squeeze %84 : memref<1x1x128xf32, #tpu.memory_space<vmem>> -> memref<1x128xf32, #tpu.memory_space<vmem>>
      %86 = tpu.memref_slice %arg7[%c0_i32_62] : memref<2x!tpu.dma_semaphore, #tpu.memory_space<semaphore_mem>> -> memref<1x!tpu.dma_semaphore, #tpu.memory_space<semaphore_mem>>
      %87 = tpu.memref_squeeze %86 : memref<1x!tpu.dma_semaphore, #tpu.memory_space<semaphore_mem>> -> memref<!tpu.dma_semaphore, #tpu.memory_space<semaphore_mem>>
      tpu.enqueue_dma source(%83 : memref<1x128xf32, #tpu.memory_space<any>>) target(%85 : memref<1x128xf32, #tpu.memory_space<vmem>>) target_semaphore(%87 : memref<!tpu.dma_semaphore, #tpu.memory_space<semaphore_mem>>)
      %c3_i32_65 = arith.constant 3 : i32
      %88 = arith.addi %57, %c3_i32_65 : i32
      %89 = arith.index_cast %88 : i32 to index
      %90 = memref.load %arg2[%89] : memref<32xi32, #tpu.memory_space<smem>>
      %c0_i32_66 = arith.constant 0 : i32
      %c31_i32_67 = arith.constant 31 : i32
      %91 = arith.maxsi %c0_i32_66, %90 : i32
      %92 = arith.minsi %c31_i32_67, %91 : i32
      %c0_i32_68 = arith.constant 0 : i32
      %c0_i32_69 = arith.constant 0 : i32
      %c0_i32_70 = arith.constant 0 : i32
      %93 = tpu.memref_slice %arg3[%92, %c0_i32_70] : memref<32x128xf32, #tpu.memory_space<any>> -> memref<1x128xf32, #tpu.memory_space<any>>
      %c0_i32_71 = arith.constant 0 : i32
      %94 = tpu.memref_slice %arg6[%c0_i32_68, %c3_i32_65, %c0_i32_71] : memref<2x8x128xf32, #tpu.memory_space<vmem>> -> memref<1x1x128xf32, #tpu.memory_space<vmem>>
      %95 = tpu.memref_squeeze %94 : memref<1x1x128xf32, #tpu.memory_space<vmem>> -> memref<1x128xf32, #tpu.memory_space<vmem>>
      %96 = tpu.memref_slice %arg7[%c0_i32_69] : memref<2x!tpu.dma_semaphore, #tpu.memory_space<semaphore_mem>> -> memref<1x!tpu.dma_semaphore, #tpu.memory_space<semaphore_mem>>
      %97 = tpu.memref_squeeze %96 : memref<1x!tpu.dma_semaphore, #tpu.memory_space<semaphore_mem>> -> memref<!tpu.dma_semaphore, #tpu.memory_space<semaphore_mem>>
      tpu.enqueue_dma source(%93 : memref<1x128xf32, #tpu.memory_space<any>>) target(%95 : memref<1x128xf32, #tpu.memory_space<vmem>>) target_semaphore(%97 : memref<!tpu.dma_semaphore, #tpu.memory_space<semaphore_mem>>)
      %c4_i32_72 = arith.constant 4 : i32
      %98 = arith.addi %57, %c4_i32_72 : i32
      %99 = arith.index_cast %98 : i32 to index
      %100 = memref.load %arg2[%99] : memref<32xi32, #tpu.memory_space<smem>>
      %c0_i32_73 = arith.constant 0 : i32
      %c31_i32_74 = arith.constant 31 : i32
      %101 = arith.maxsi %c0_i32_73, %100 : i32
      %102 = arith.minsi %c31_i32_74, %101 : i32
      %c0_i32_75 = arith.constant 0 : i32
      %c0_i32_76 = arith.constant 0 : i32
      %c0_i32_77 = arith.constant 0 : i32
      %103 = tpu.memref_slice %arg3[%102, %c0_i32_77] : memref<32x128xf32, #tpu.memory_space<any>> -> memref<1x128xf32, #tpu.memory_space<any>>
      %c0_i32_78 = arith.constant 0 : i32
      %104 = tpu.memref_slice %arg6[%c0_i32_75, %c4_i32_72, %c0_i32_78] : memref<2x8x128xf32, #tpu.memory_space<vmem>> -> memref<1x1x128xf32, #tpu.memory_space<vmem>>
      %105 = tpu.memref_squeeze %104 : memref<1x1x128xf32, #tpu.memory_space<vmem>> -> memref<1x128xf32, #tpu.memory_space<vmem>>
      %106 = tpu.memref_slice %arg7[%c0_i32_76] : memref<2x!tpu.dma_semaphore, #tpu.memory_space<semaphore_mem>> -> memref<1x!tpu.dma_semaphore, #tpu.memory_space<semaphore_mem>>
      %107 = tpu.memref_squeeze %106 : memref<1x!tpu.dma_semaphore, #tpu.memory_space<semaphore_mem>> -> memref<!tpu.dma_semaphore, #tpu.memory_space<semaphore_mem>>
      tpu.enqueue_dma source(%103 : memref<1x128xf32, #tpu.memory_space<any>>) target(%105 : memref<1x128xf32, #tpu.memory_space<vmem>>) target_semaphore(%107 : memref<!tpu.dma_semaphore, #tpu.memory_space<semaphore_mem>>)
      %c5_i32_79 = arith.constant 5 : i32
      %108 = arith.addi %57, %c5_i32_79 : i32
      %109 = arith.index_cast %108 : i32 to index
      %110 = memref.load %arg2[%109] : memref<32xi32, #tpu.memory_space<smem>>
      %c0_i32_80 = arith.constant 0 : i32
      %c31_i32_81 = arith.constant 31 : i32
      %111 = arith.maxsi %c0_i32_80, %110 : i32
      %112 = arith.minsi %c31_i32_81, %111 : i32
      %c0_i32_82 = arith.constant 0 : i32
      %c0_i32_83 = arith.constant 0 : i32
      %c0_i32_84 = arith.constant 0 : i32
      %113 = tpu.memref_slice %arg3[%112, %c0_i32_84] : memref<32x128xf32, #tpu.memory_space<any>> -> memref<1x128xf32, #tpu.memory_space<any>>
      %c0_i32_85 = arith.constant 0 : i32
      %114 = tpu.memref_slice %arg6[%c0_i32_82, %c5_i32_79, %c0_i32_85] : memref<2x8x128xf32, #tpu.memory_space<vmem>> -> memref<1x1x128xf32, #tpu.memory_space<vmem>>
      %115 = tpu.memref_squeeze %114 : memref<1x1x128xf32, #tpu.memory_space<vmem>> -> memref<1x128xf32, #tpu.memory_space<vmem>>
      %116 = tpu.memref_slice %arg7[%c0_i32_83] : memref<2x!tpu.dma_semaphore, #tpu.memory_space<semaphore_mem>> -> memref<1x!tpu.dma_semaphore, #tpu.memory_space<semaphore_mem>>
      %117 = tpu.memref_squeeze %116 : memref<1x!tpu.dma_semaphore, #tpu.memory_space<semaphore_mem>> -> memref<!tpu.dma_semaphore, #tpu.memory_space<semaphore_mem>>
      tpu.enqueue_dma source(%113 : memref<1x128xf32, #tpu.memory_space<any>>) target(%115 : memref<1x128xf32, #tpu.memory_space<vmem>>) target_semaphore(%117 : memref<!tpu.dma_semaphore, #tpu.memory_space<semaphore_mem>>)
      %c6_i32_86 = arith.constant 6 : i32
      %118 = arith.addi %57, %c6_i32_86 : i32
      %119 = arith.index_cast %118 : i32 to index
      %120 = memref.load %arg2[%119] : memref<32xi32, #tpu.memory_space<smem>>
      %c0_i32_87 = arith.constant 0 : i32
      %c31_i32_88 = arith.constant 31 : i32
      %121 = arith.maxsi %c0_i32_87, %120 : i32
      %122 = arith.minsi %c31_i32_88, %121 : i32
      %c0_i32_89 = arith.constant 0 : i32
      %c0_i32_90 = arith.constant 0 : i32
      %c0_i32_91 = arith.constant 0 : i32
      %123 = tpu.memref_slice %arg3[%122, %c0_i32_91] : memref<32x128xf32, #tpu.memory_space<any>> -> memref<1x128xf32, #tpu.memory_space<any>>
      %c0_i32_92 = arith.constant 0 : i32
      %124 = tpu.memref_slice %arg6[%c0_i32_89, %c6_i32_86, %c0_i32_92] : memref<2x8x128xf32, #tpu.memory_space<vmem>> -> memref<1x1x128xf32, #tpu.memory_space<vmem>>
      %125 = tpu.memref_squeeze %124 : memref<1x1x128xf32, #tpu.memory_space<vmem>> -> memref<1x128xf32, #tpu.memory_space<vmem>>
      %126 = tpu.memref_slice %arg7[%c0_i32_90] : memref<2x!tpu.dma_semaphore, #tpu.memory_space<semaphore_mem>> -> memref<1x!tpu.dma_semaphore, #tpu.memory_space<semaphore_mem>>
      %127 = tpu.memref_squeeze %126 : memref<1x!tpu.dma_semaphore, #tpu.memory_space<semaphore_mem>> -> memref<!tpu.dma_semaphore, #tpu.memory_space<semaphore_mem>>
      tpu.enqueue_dma source(%123 : memref<1x128xf32, #tpu.memory_space<any>>) target(%125 : memref<1x128xf32, #tpu.memory_space<vmem>>) target_semaphore(%127 : memref<!tpu.dma_semaphore, #tpu.memory_space<semaphore_mem>>)
      %c7_i32_93 = arith.constant 7 : i32
      %128 = arith.addi %57, %c7_i32_93 : i32
      %129 = arith.index_cast %128 : i32 to index
      %130 = memref.load %arg2[%129] : memref<32xi32, #tpu.memory_space<smem>>
      %c0_i32_94 = arith.constant 0 : i32
      %c31_i32_95 = arith.constant 31 : i32
      %131 = arith.maxsi %c0_i32_94, %130 : i32
      %132 = arith.minsi %c31_i32_95, %131 : i32
      %c0_i32_96 = arith.constant 0 : i32
      %c0_i32_97 = arith.constant 0 : i32
      %c0_i32_98 = arith.constant 0 : i32
      %133 = tpu.memref_slice %arg3[%132, %c0_i32_98] : memref<32x128xf32, #tpu.memory_space<any>> -> memref<1x128xf32, #tpu.memory_space<any>>
      %c0_i32_99 = arith.constant 0 : i32
      %134 = tpu.memref_slice %arg6[%c0_i32_96, %c7_i32_93, %c0_i32_99] : memref<2x8x128xf32, #tpu.memory_space<vmem>> -> memref<1x1x128xf32, #tpu.memory_space<vmem>>
      %135 = tpu.memref_squeeze %134 : memref<1x1x128xf32, #tpu.memory_space<vmem>> -> memref<1x128xf32, #tpu.memory_space<vmem>>
      %136 = tpu.memref_slice %arg7[%c0_i32_97] : memref<2x!tpu.dma_semaphore, #tpu.memory_space<semaphore_mem>> -> memref<1x!tpu.dma_semaphore, #tpu.memory_space<semaphore_mem>>
      %137 = tpu.memref_squeeze %136 : memref<1x!tpu.dma_semaphore, #tpu.memory_space<semaphore_mem>> -> memref<!tpu.dma_semaphore, #tpu.memory_space<semaphore_mem>>
      tpu.enqueue_dma source(%133 : memref<1x128xf32, #tpu.memory_space<any>>) target(%135 : memref<1x128xf32, #tpu.memory_space<vmem>>) target_semaphore(%137 : memref<!tpu.dma_semaphore, #tpu.memory_space<semaphore_mem>>)
      %c8_i32_100 = arith.constant 8 : i32
    } else {
    }
    %c1_i32 = arith.constant 1 : i32
    %4 = arith.addi %arg1, %c1_i32 : i32
    %c2_i32_1 = arith.constant 2 : i32
    %5 = arith.cmpi slt, %4, %c2_i32_1 : i32
    %6 = arith.extui %5 : i1 to i32
    %c0_i32_2 = arith.constant 0 : i32
    %7 = arith.cmpi ne, %6, %c0_i32_2 : i32
    scf.if %7 {
      %c1_i32_44 = arith.constant 1 : i32
      %56 = arith.addi %arg1, %c1_i32_44 : i32
      %c1_i32_45 = arith.constant 1 : i32
      %57 = arith.addi %arg1, %c1_i32_45 : i32
      %c2_i32_46 = arith.constant 2 : i32
      %58 = arith.remsi %57, %c2_i32_46 : i32
      %c2_i32_47 = arith.constant 2 : i32
      %59 = arith.muli %56, %c2_i32_47 : i32
      %60 = arith.addi %59, %arg0 : i32
      %c8_i32 = arith.constant 8 : i32
      %61 = arith.muli %60, %c8_i32 : i32
      %c0_i32_48 = arith.constant 0 : i32
      %62 = arith.addi %61, %c0_i32_48 : i32
      %63 = arith.index_cast %62 : i32 to index
      %64 = memref.load %arg2[%63] : memref<32xi32, #tpu.memory_space<smem>>
      %c0_i32_49 = arith.constant 0 : i32
      %c31_i32 = arith.constant 31 : i32
      %65 = arith.maxsi %c0_i32_49, %64 : i32
      %66 = arith.minsi %c31_i32, %65 : i32
      %c0_i32_50 = arith.constant 0 : i32
      %67 = tpu.memref_slice %arg3[%66, %c0_i32_50] : memref<32x128xf32, #tpu.memory_space<any>> -> memref<1x128xf32, #tpu.memory_space<any>>
      %c0_i32_51 = arith.constant 0 : i32
      %68 = tpu.memref_slice %arg6[%58, %c0_i32_48, %c0_i32_51] : memref<2x8x128xf32, #tpu.memory_space<vmem>> -> memref<1x1x128xf32, #tpu.memory_space<vmem>>
      %69 = tpu.memref_squeeze %68 : memref<1x1x128xf32, #tpu.memory_space<vmem>> -> memref<1x128xf32, #tpu.memory_space<vmem>>
      %70 = tpu.memref_slice %arg7[%58] : memref<2x!tpu.dma_semaphore, #tpu.memory_space<semaphore_mem>> -> memref<1x!tpu.dma_semaphore, #tpu.memory_space<semaphore_mem>>
      %71 = tpu.memref_squeeze %70 : memref<1x!tpu.dma_semaphore, #tpu.memory_space<semaphore_mem>> -> memref<!tpu.dma_semaphore, #tpu.memory_space<semaphore_mem>>
      tpu.enqueue_dma source(%67 : memref<1x128xf32, #tpu.memory_space<any>>) target(%69 : memref<1x128xf32, #tpu.memory_space<vmem>>) target_semaphore(%71 : memref<!tpu.dma_semaphore, #tpu.memory_space<semaphore_mem>>)
      %c1_i32_52 = arith.constant 1 : i32
      %72 = arith.addi %61, %c1_i32_52 : i32
      %73 = arith.index_cast %72 : i32 to index
      %74 = memref.load %arg2[%73] : memref<32xi32, #tpu.memory_space<smem>>
      %c0_i32_53 = arith.constant 0 : i32
      %c31_i32_54 = arith.constant 31 : i32
      %75 = arith.maxsi %c0_i32_53, %74 : i32
      %76 = arith.minsi %c31_i32_54, %75 : i32
      %c0_i32_55 = arith.constant 0 : i32
      %77 = tpu.memref_slice %arg3[%76, %c0_i32_55] : memref<32x128xf32, #tpu.memory_space<any>> -> memref<1x128xf32, #tpu.memory_space<any>>
      %c0_i32_56 = arith.constant 0 : i32
      %78 = tpu.memref_slice %arg6[%58, %c1_i32_52, %c0_i32_56] : memref<2x8x128xf32, #tpu.memory_space<vmem>> -> memref<1x1x128xf32, #tpu.memory_space<vmem>>
      %79 = tpu.memref_squeeze %78 : memref<1x1x128xf32, #tpu.memory_space<vmem>> -> memref<1x128xf32, #tpu.memory_space<vmem>>
      %80 = tpu.memref_slice %arg7[%58] : memref<2x!tpu.dma_semaphore, #tpu.memory_space<semaphore_mem>> -> memref<1x!tpu.dma_semaphore, #tpu.memory_space<semaphore_mem>>
      %81 = tpu.memref_squeeze %80 : memref<1x!tpu.dma_semaphore, #tpu.memory_space<semaphore_mem>> -> memref<!tpu.dma_semaphore, #tpu.memory_space<semaphore_mem>>
      tpu.enqueue_dma source(%77 : memref<1x128xf32, #tpu.memory_space<any>>) target(%79 : memref<1x128xf32, #tpu.memory_space<vmem>>) target_semaphore(%81 : memref<!tpu.dma_semaphore, #tpu.memory_space<semaphore_mem>>)
      %c2_i32_57 = arith.constant 2 : i32
      %82 = arith.addi %61, %c2_i32_57 : i32
      %83 = arith.index_cast %82 : i32 to index
      %84 = memref.load %arg2[%83] : memref<32xi32, #tpu.memory_space<smem>>
      %c0_i32_58 = arith.constant 0 : i32
      %c31_i32_59 = arith.constant 31 : i32
      %85 = arith.maxsi %c0_i32_58, %84 : i32
      %86 = arith.minsi %c31_i32_59, %85 : i32
      %c0_i32_60 = arith.constant 0 : i32
      %87 = tpu.memref_slice %arg3[%86, %c0_i32_60] : memref<32x128xf32, #tpu.memory_space<any>> -> memref<1x128xf32, #tpu.memory_space<any>>
      %c0_i32_61 = arith.constant 0 : i32
      %88 = tpu.memref_slice %arg6[%58, %c2_i32_57, %c0_i32_61] : memref<2x8x128xf32, #tpu.memory_space<vmem>> -> memref<1x1x128xf32, #tpu.memory_space<vmem>>
      %89 = tpu.memref_squeeze %88 : memref<1x1x128xf32, #tpu.memory_space<vmem>> -> memref<1x128xf32, #tpu.memory_space<vmem>>
      %90 = tpu.memref_slice %arg7[%58] : memref<2x!tpu.dma_semaphore, #tpu.memory_space<semaphore_mem>> -> memref<1x!tpu.dma_semaphore, #tpu.memory_space<semaphore_mem>>
      %91 = tpu.memref_squeeze %90 : memref<1x!tpu.dma_semaphore, #tpu.memory_space<semaphore_mem>> -> memref<!tpu.dma_semaphore, #tpu.memory_space<semaphore_mem>>
      tpu.enqueue_dma source(%87 : memref<1x128xf32, #tpu.memory_space<any>>) target(%89 : memref<1x128xf32, #tpu.memory_space<vmem>>) target_semaphore(%91 : memref<!tpu.dma_semaphore, #tpu.memory_space<semaphore_mem>>)
      %c3_i32_62 = arith.constant 3 : i32
      %92 = arith.addi %61, %c3_i32_62 : i32
      %93 = arith.index_cast %92 : i32 to index
      %94 = memref.load %arg2[%93] : memref<32xi32, #tpu.memory_space<smem>>
      %c0_i32_63 = arith.constant 0 : i32
      %c31_i32_64 = arith.constant 31 : i32
      %95 = arith.maxsi %c0_i32_63, %94 : i32
      %96 = arith.minsi %c31_i32_64, %95 : i32
      %c0_i32_65 = arith.constant 0 : i32
      %97 = tpu.memref_slice %arg3[%96, %c0_i32_65] : memref<32x128xf32, #tpu.memory_space<any>> -> memref<1x128xf32, #tpu.memory_space<any>>
      %c0_i32_66 = arith.constant 0 : i32
      %98 = tpu.memref_slice %arg6[%58, %c3_i32_62, %c0_i32_66] : memref<2x8x128xf32, #tpu.memory_space<vmem>> -> memref<1x1x128xf32, #tpu.memory_space<vmem>>
      %99 = tpu.memref_squeeze %98 : memref<1x1x128xf32, #tpu.memory_space<vmem>> -> memref<1x128xf32, #tpu.memory_space<vmem>>
      %100 = tpu.memref_slice %arg7[%58] : memref<2x!tpu.dma_semaphore, #tpu.memory_space<semaphore_mem>> -> memref<1x!tpu.dma_semaphore, #tpu.memory_space<semaphore_mem>>
      %101 = tpu.memref_squeeze %100 : memref<1x!tpu.dma_semaphore, #tpu.memory_space<semaphore_mem>> -> memref<!tpu.dma_semaphore, #tpu.memory_space<semaphore_mem>>
      tpu.enqueue_dma source(%97 : memref<1x128xf32, #tpu.memory_space<any>>) target(%99 : memref<1x128xf32, #tpu.memory_space<vmem>>) target_semaphore(%101 : memref<!tpu.dma_semaphore, #tpu.memory_space<semaphore_mem>>)
      %c4_i32_67 = arith.constant 4 : i32
      %102 = arith.addi %61, %c4_i32_67 : i32
      %103 = arith.index_cast %102 : i32 to index
      %104 = memref.load %arg2[%103] : memref<32xi32, #tpu.memory_space<smem>>
      %c0_i32_68 = arith.constant 0 : i32
      %c31_i32_69 = arith.constant 31 : i32
      %105 = arith.maxsi %c0_i32_68, %104 : i32
      %106 = arith.minsi %c31_i32_69, %105 : i32
      %c0_i32_70 = arith.constant 0 : i32
      %107 = tpu.memref_slice %arg3[%106, %c0_i32_70] : memref<32x128xf32, #tpu.memory_space<any>> -> memref<1x128xf32, #tpu.memory_space<any>>
      %c0_i32_71 = arith.constant 0 : i32
      %108 = tpu.memref_slice %arg6[%58, %c4_i32_67, %c0_i32_71] : memref<2x8x128xf32, #tpu.memory_space<vmem>> -> memref<1x1x128xf32, #tpu.memory_space<vmem>>
      %109 = tpu.memref_squeeze %108 : memref<1x1x128xf32, #tpu.memory_space<vmem>> -> memref<1x128xf32, #tpu.memory_space<vmem>>
      %110 = tpu.memref_slice %arg7[%58] : memref<2x!tpu.dma_semaphore, #tpu.memory_space<semaphore_mem>> -> memref<1x!tpu.dma_semaphore, #tpu.memory_space<semaphore_mem>>
      %111 = tpu.memref_squeeze %110 : memref<1x!tpu.dma_semaphore, #tpu.memory_space<semaphore_mem>> -> memref<!tpu.dma_semaphore, #tpu.memory_space<semaphore_mem>>
      tpu.enqueue_dma source(%107 : memref<1x128xf32, #tpu.memory_space<any>>) target(%109 : memref<1x128xf32, #tpu.memory_space<vmem>>) target_semaphore(%111 : memref<!tpu.dma_semaphore, #tpu.memory_space<semaphore_mem>>)
      %c5_i32_72 = arith.constant 5 : i32
      %112 = arith.addi %61, %c5_i32_72 : i32
      %113 = arith.index_cast %112 : i32 to index
      %114 = memref.load %arg2[%113] : memref<32xi32, #tpu.memory_space<smem>>
      %c0_i32_73 = arith.constant 0 : i32
      %c31_i32_74 = arith.constant 31 : i32
      %115 = arith.maxsi %c0_i32_73, %114 : i32
      %116 = arith.minsi %c31_i32_74, %115 : i32
      %c0_i32_75 = arith.constant 0 : i32
      %117 = tpu.memref_slice %arg3[%116, %c0_i32_75] : memref<32x128xf32, #tpu.memory_space<any>> -> memref<1x128xf32, #tpu.memory_space<any>>
      %c0_i32_76 = arith.constant 0 : i32
      %118 = tpu.memref_slice %arg6[%58, %c5_i32_72, %c0_i32_76] : memref<2x8x128xf32, #tpu.memory_space<vmem>> -> memref<1x1x128xf32, #tpu.memory_space<vmem>>
      %119 = tpu.memref_squeeze %118 : memref<1x1x128xf32, #tpu.memory_space<vmem>> -> memref<1x128xf32, #tpu.memory_space<vmem>>
      %120 = tpu.memref_slice %arg7[%58] : memref<2x!tpu.dma_semaphore, #tpu.memory_space<semaphore_mem>> -> memref<1x!tpu.dma_semaphore, #tpu.memory_space<semaphore_mem>>
      %121 = tpu.memref_squeeze %120 : memref<1x!tpu.dma_semaphore, #tpu.memory_space<semaphore_mem>> -> memref<!tpu.dma_semaphore, #tpu.memory_space<semaphore_mem>>
      tpu.enqueue_dma source(%117 : memref<1x128xf32, #tpu.memory_space<any>>) target(%119 : memref<1x128xf32, #tpu.memory_space<vmem>>) target_semaphore(%121 : memref<!tpu.dma_semaphore, #tpu.memory_space<semaphore_mem>>)
      %c6_i32_77 = arith.constant 6 : i32
      %122 = arith.addi %61, %c6_i32_77 : i32
      %123 = arith.index_cast %122 : i32 to index
      %124 = memref.load %arg2[%123] : memref<32xi32, #tpu.memory_space<smem>>
      %c0_i32_78 = arith.constant 0 : i32
      %c31_i32_79 = arith.constant 31 : i32
      %125 = arith.maxsi %c0_i32_78, %124 : i32
      %126 = arith.minsi %c31_i32_79, %125 : i32
      %c0_i32_80 = arith.constant 0 : i32
      %127 = tpu.memref_slice %arg3[%126, %c0_i32_80] : memref<32x128xf32, #tpu.memory_space<any>> -> memref<1x128xf32, #tpu.memory_space<any>>
      %c0_i32_81 = arith.constant 0 : i32
      %128 = tpu.memref_slice %arg6[%58, %c6_i32_77, %c0_i32_81] : memref<2x8x128xf32, #tpu.memory_space<vmem>> -> memref<1x1x128xf32, #tpu.memory_space<vmem>>
      %129 = tpu.memref_squeeze %128 : memref<1x1x128xf32, #tpu.memory_space<vmem>> -> memref<1x128xf32, #tpu.memory_space<vmem>>
      %130 = tpu.memref_slice %arg7[%58] : memref<2x!tpu.dma_semaphore, #tpu.memory_space<semaphore_mem>> -> memref<1x!tpu.dma_semaphore, #tpu.memory_space<semaphore_mem>>
      %131 = tpu.memref_squeeze %130 : memref<1x!tpu.dma_semaphore, #tpu.memory_space<semaphore_mem>> -> memref<!tpu.dma_semaphore, #tpu.memory_space<semaphore_mem>>
      tpu.enqueue_dma source(%127 : memref<1x128xf32, #tpu.memory_space<any>>) target(%129 : memref<1x128xf32, #tpu.memory_space<vmem>>) target_semaphore(%131 : memref<!tpu.dma_semaphore, #tpu.memory_space<semaphore_mem>>)
      %c7_i32_82 = arith.constant 7 : i32
      %132 = arith.addi %61, %c7_i32_82 : i32
      %133 = arith.index_cast %132 : i32 to index
      %134 = memref.load %arg2[%133] : memref<32xi32, #tpu.memory_space<smem>>
      %c0_i32_83 = arith.constant 0 : i32
      %c31_i32_84 = arith.constant 31 : i32
      %135 = arith.maxsi %c0_i32_83, %134 : i32
      %136 = arith.minsi %c31_i32_84, %135 : i32
      %c0_i32_85 = arith.constant 0 : i32
      %137 = tpu.memref_slice %arg3[%136, %c0_i32_85] : memref<32x128xf32, #tpu.memory_space<any>> -> memref<1x128xf32, #tpu.memory_space<any>>
      %c0_i32_86 = arith.constant 0 : i32
      %138 = tpu.memref_slice %arg6[%58, %c7_i32_82, %c0_i32_86] : memref<2x8x128xf32, #tpu.memory_space<vmem>> -> memref<1x1x128xf32, #tpu.memory_space<vmem>>
      %139 = tpu.memref_squeeze %138 : memref<1x1x128xf32, #tpu.memory_space<vmem>> -> memref<1x128xf32, #tpu.memory_space<vmem>>
      %140 = tpu.memref_slice %arg7[%58] : memref<2x!tpu.dma_semaphore, #tpu.memory_space<semaphore_mem>> -> memref<1x!tpu.dma_semaphore, #tpu.memory_space<semaphore_mem>>
      %141 = tpu.memref_squeeze %140 : memref<1x!tpu.dma_semaphore, #tpu.memory_space<semaphore_mem>> -> memref<!tpu.dma_semaphore, #tpu.memory_space<semaphore_mem>>
      tpu.enqueue_dma source(%137 : memref<1x128xf32, #tpu.memory_space<any>>) target(%139 : memref<1x128xf32, #tpu.memory_space<vmem>>) target_semaphore(%141 : memref<!tpu.dma_semaphore, #tpu.memory_space<semaphore_mem>>)
      %c8_i32_87 = arith.constant 8 : i32
    } else {
    }
    %c0_i32_3 = arith.constant 0 : i32
    %c0_i32_4 = arith.constant 0 : i32
    %c0_i32_5 = arith.constant 0 : i32
    %8 = tpu.memref_slice %arg3[%c0_i32_4, %c0_i32_5] : memref<32x128xf32, #tpu.memory_space<any>> -> memref<1x128xf32, #tpu.memory_space<any>>
    %c0_i32_6 = arith.constant 0 : i32
    %c0_i32_7 = arith.constant 0 : i32
    %9 = tpu.memref_slice %arg6[%0, %c0_i32_6, %c0_i32_7] : memref<2x8x128xf32, #tpu.memory_space<vmem>> -> memref<1x1x128xf32, #tpu.memory_space<vmem>>
    %10 = tpu.memref_squeeze %9 : memref<1x1x128xf32, #tpu.memory_space<vmem>> -> memref<1x128xf32, #tpu.memory_space<vmem>>
    %11 = tpu.memref_slice %arg7[%0] : memref<2x!tpu.dma_semaphore, #tpu.memory_space<semaphore_mem>> -> memref<1x!tpu.dma_semaphore, #tpu.memory_space<semaphore_mem>>
    %12 = tpu.memref_squeeze %11 : memref<1x!tpu.dma_semaphore, #tpu.memory_space<semaphore_mem>> -> memref<!tpu.dma_semaphore, #tpu.memory_space<semaphore_mem>>
    tpu.wait_dma2 semaphore(%12 : memref<!tpu.dma_semaphore, #tpu.memory_space<semaphore_mem>>) src(%8 : memref<1x128xf32, #tpu.memory_space<any>>) dst(%10 : memref<1x128xf32, #tpu.memory_space<vmem>>)
    %c1_i32_8 = arith.constant 1 : i32
    %c0_i32_9 = arith.constant 0 : i32
    %c0_i32_10 = arith.constant 0 : i32
    %13 = tpu.memref_slice %arg3[%c0_i32_9, %c0_i32_10] : memref<32x128xf32, #tpu.memory_space<any>> -> memref<1x128xf32, #tpu.memory_space<any>>
    %c0_i32_11 = arith.constant 0 : i32
    %c0_i32_12 = arith.constant 0 : i32
    %14 = tpu.memref_slice %arg6[%0, %c0_i32_11, %c0_i32_12] : memref<2x8x128xf32, #tpu.memory_space<vmem>> -> memref<1x1x128xf32, #tpu.memory_space<vmem>>
    %15 = tpu.memref_squeeze %14 : memref<1x1x128xf32, #tpu.memory_space<vmem>> -> memref<1x128xf32, #tpu.memory_space<vmem>>
    %16 = tpu.memref_slice %arg7[%0] : memref<2x!tpu.dma_semaphore, #tpu.memory_space<semaphore_mem>> -> memref<1x!tpu.dma_semaphore, #tpu.memory_space<semaphore_mem>>
    %17 = tpu.memref_squeeze %16 : memref<1x!tpu.dma_semaphore, #tpu.memory_space<semaphore_mem>> -> memref<!tpu.dma_semaphore, #tpu.memory_space<semaphore_mem>>
    tpu.wait_dma2 semaphore(%17 : memref<!tpu.dma_semaphore, #tpu.memory_space<semaphore_mem>>) src(%13 : memref<1x128xf32, #tpu.memory_space<any>>) dst(%15 : memref<1x128xf32, #tpu.memory_space<vmem>>)
    %c2_i32_13 = arith.constant 2 : i32
    %c0_i32_14 = arith.constant 0 : i32
    %c0_i32_15 = arith.constant 0 : i32
    %18 = tpu.memref_slice %arg3[%c0_i32_14, %c0_i32_15] : memref<32x128xf32, #tpu.memory_space<any>> -> memref<1x128xf32, #tpu.memory_space<any>>
    %c0_i32_16 = arith.constant 0 : i32
    %c0_i32_17 = arith.constant 0 : i32
    %19 = tpu.memref_slice %arg6[%0, %c0_i32_16, %c0_i32_17] : memref<2x8x128xf32, #tpu.memory_space<vmem>> -> memref<1x1x128xf32, #tpu.memory_space<vmem>>
    %20 = tpu.memref_squeeze %19 : memref<1x1x128xf32, #tpu.memory_space<vmem>> -> memref<1x128xf32, #tpu.memory_space<vmem>>
    %21 = tpu.memref_slice %arg7[%0] : memref<2x!tpu.dma_semaphore, #tpu.memory_space<semaphore_mem>> -> memref<1x!tpu.dma_semaphore, #tpu.memory_space<semaphore_mem>>
    %22 = tpu.memref_squeeze %21 : memref<1x!tpu.dma_semaphore, #tpu.memory_space<semaphore_mem>> -> memref<!tpu.dma_semaphore, #tpu.memory_space<semaphore_mem>>
    tpu.wait_dma2 semaphore(%22 : memref<!tpu.dma_semaphore, #tpu.memory_space<semaphore_mem>>) src(%18 : memref<1x128xf32, #tpu.memory_space<any>>) dst(%20 : memref<1x128xf32, #tpu.memory_space<vmem>>)
    %c3_i32 = arith.constant 3 : i32
    %c0_i32_18 = arith.constant 0 : i32
    %c0_i32_19 = arith.constant 0 : i32
    %23 = tpu.memref_slice %arg3[%c0_i32_18, %c0_i32_19] : memref<32x128xf32, #tpu.memory_space<any>> -> memref<1x128xf32, #tpu.memory_space<any>>
    %c0_i32_20 = arith.constant 0 : i32
    %c0_i32_21 = arith.constant 0 : i32
    %24 = tpu.memref_slice %arg6[%0, %c0_i32_20, %c0_i32_21] : memref<2x8x128xf32, #tpu.memory_space<vmem>> -> memref<1x1x128xf32, #tpu.memory_space<vmem>>
    %25 = tpu.memref_squeeze %24 : memref<1x1x128xf32, #tpu.memory_space<vmem>> -> memref<1x128xf32, #tpu.memory_space<vmem>>
    %26 = tpu.memref_slice %arg7[%0] : memref<2x!tpu.dma_semaphore, #tpu.memory_space<semaphore_mem>> -> memref<1x!tpu.dma_semaphore, #tpu.memory_space<semaphore_mem>>
    %27 = tpu.memref_squeeze %26 : memref<1x!tpu.dma_semaphore, #tpu.memory_space<semaphore_mem>> -> memref<!tpu.dma_semaphore, #tpu.memory_space<semaphore_mem>>
    tpu.wait_dma2 semaphore(%27 : memref<!tpu.dma_semaphore, #tpu.memory_space<semaphore_mem>>) src(%23 : memref<1x128xf32, #tpu.memory_space<any>>) dst(%25 : memref<1x128xf32, #tpu.memory_space<vmem>>)
    %c4_i32 = arith.constant 4 : i32
    %c0_i32_22 = arith.constant 0 : i32
    %c0_i32_23 = arith.constant 0 : i32
    %28 = tpu.memref_slice %arg3[%c0_i32_22, %c0_i32_23] : memref<32x128xf32, #tpu.memory_space<any>> -> memref<1x128xf32, #tpu.memory_space<any>>
    %c0_i32_24 = arith.constant 0 : i32
    %c0_i32_25 = arith.constant 0 : i32
    %29 = tpu.memref_slice %arg6[%0, %c0_i32_24, %c0_i32_25] : memref<2x8x128xf32, #tpu.memory_space<vmem>> -> memref<1x1x128xf32, #tpu.memory_space<vmem>>
    %30 = tpu.memref_squeeze %29 : memref<1x1x128xf32, #tpu.memory_space<vmem>> -> memref<1x128xf32, #tpu.memory_space<vmem>>
    %31 = tpu.memref_slice %arg7[%0] : memref<2x!tpu.dma_semaphore, #tpu.memory_space<semaphore_mem>> -> memref<1x!tpu.dma_semaphore, #tpu.memory_space<semaphore_mem>>
    %32 = tpu.memref_squeeze %31 : memref<1x!tpu.dma_semaphore, #tpu.memory_space<semaphore_mem>> -> memref<!tpu.dma_semaphore, #tpu.memory_space<semaphore_mem>>
    tpu.wait_dma2 semaphore(%32 : memref<!tpu.dma_semaphore, #tpu.memory_space<semaphore_mem>>) src(%28 : memref<1x128xf32, #tpu.memory_space<any>>) dst(%30 : memref<1x128xf32, #tpu.memory_space<vmem>>)
    %c5_i32 = arith.constant 5 : i32
    %c0_i32_26 = arith.constant 0 : i32
    %c0_i32_27 = arith.constant 0 : i32
    %33 = tpu.memref_slice %arg3[%c0_i32_26, %c0_i32_27] : memref<32x128xf32, #tpu.memory_space<any>> -> memref<1x128xf32, #tpu.memory_space<any>>
    %c0_i32_28 = arith.constant 0 : i32
    %c0_i32_29 = arith.constant 0 : i32
    %34 = tpu.memref_slice %arg6[%0, %c0_i32_28, %c0_i32_29] : memref<2x8x128xf32, #tpu.memory_space<vmem>> -> memref<1x1x128xf32, #tpu.memory_space<vmem>>
    %35 = tpu.memref_squeeze %34 : memref<1x1x128xf32, #tpu.memory_space<vmem>> -> memref<1x128xf32, #tpu.memory_space<vmem>>
    %36 = tpu.memref_slice %arg7[%0] : memref<2x!tpu.dma_semaphore, #tpu.memory_space<semaphore_mem>> -> memref<1x!tpu.dma_semaphore, #tpu.memory_space<semaphore_mem>>
    %37 = tpu.memref_squeeze %36 : memref<1x!tpu.dma_semaphore, #tpu.memory_space<semaphore_mem>> -> memref<!tpu.dma_semaphore, #tpu.memory_space<semaphore_mem>>
    tpu.wait_dma2 semaphore(%37 : memref<!tpu.dma_semaphore, #tpu.memory_space<semaphore_mem>>) src(%33 : memref<1x128xf32, #tpu.memory_space<any>>) dst(%35 : memref<1x128xf32, #tpu.memory_space<vmem>>)
    %c6_i32 = arith.constant 6 : i32
    %c0_i32_30 = arith.constant 0 : i32
    %c0_i32_31 = arith.constant 0 : i32
    %38 = tpu.memref_slice %arg3[%c0_i32_30, %c0_i32_31] : memref<32x128xf32, #tpu.memory_space<any>> -> memref<1x128xf32, #tpu.memory_space<any>>
    %c0_i32_32 = arith.constant 0 : i32
    %c0_i32_33 = arith.constant 0 : i32
    %39 = tpu.memref_slice %arg6[%0, %c0_i32_32, %c0_i32_33] : memref<2x8x128xf32, #tpu.memory_space<vmem>> -> memref<1x1x128xf32, #tpu.memory_space<vmem>>
    %40 = tpu.memref_squeeze %39 : memref<1x1x128xf32, #tpu.memory_space<vmem>> -> memref<1x128xf32, #tpu.memory_space<vmem>>
    %41 = tpu.memref_slice %arg7[%0] : memref<2x!tpu.dma_semaphore, #tpu.memory_space<semaphore_mem>> -> memref<1x!tpu.dma_semaphore, #tpu.memory_space<semaphore_mem>>
    %42 = tpu.memref_squeeze %41 : memref<1x!tpu.dma_semaphore, #tpu.memory_space<semaphore_mem>> -> memref<!tpu.dma_semaphore, #tpu.memory_space<semaphore_mem>>
    tpu.wait_dma2 semaphore(%42 : memref<!tpu.dma_semaphore, #tpu.memory_space<semaphore_mem>>) src(%38 : memref<1x128xf32, #tpu.memory_space<any>>) dst(%40 : memref<1x128xf32, #tpu.memory_space<vmem>>)
    %c7_i32 = arith.constant 7 : i32
    %c0_i32_34 = arith.constant 0 : i32
    %c0_i32_35 = arith.constant 0 : i32
    %43 = tpu.memref_slice %arg3[%c0_i32_34, %c0_i32_35] : memref<32x128xf32, #tpu.memory_space<any>> -> memref<1x128xf32, #tpu.memory_space<any>>
    %c0_i32_36 = arith.constant 0 : i32
    %c0_i32_37 = arith.constant 0 : i32
    %44 = tpu.memref_slice %arg6[%0, %c0_i32_36, %c0_i32_37] : memref<2x8x128xf32, #tpu.memory_space<vmem>> -> memref<1x1x128xf32, #tpu.memory_space<vmem>>
    %45 = tpu.memref_squeeze %44 : memref<1x1x128xf32, #tpu.memory_space<vmem>> -> memref<1x128xf32, #tpu.memory_space<vmem>>
    %46 = tpu.memref_slice %arg7[%0] : memref<2x!tpu.dma_semaphore, #tpu.memory_space<semaphore_mem>> -> memref<1x!tpu.dma_semaphore, #tpu.memory_space<semaphore_mem>>
    %47 = tpu.memref_squeeze %46 : memref<1x!tpu.dma_semaphore, #tpu.memory_space<semaphore_mem>> -> memref<!tpu.dma_semaphore, #tpu.memory_space<semaphore_mem>>
    tpu.wait_dma2 semaphore(%47 : memref<!tpu.dma_semaphore, #tpu.memory_space<semaphore_mem>>) src(%43 : memref<1x128xf32, #tpu.memory_space<any>>) dst(%45 : memref<1x128xf32, #tpu.memory_space<vmem>>)
    %48 = arith.index_cast %0 : i32 to index
    %c0 = arith.constant 0 : index
    %c0_38 = arith.constant 0 : index
    %49 = vector.load %arg6[%48, %c0, %c0_38] : memref<2x8x128xf32, #tpu.memory_space<vmem>>, vector<1x8x128xf32>
    %50 = vector.shape_cast %49 : vector<1x8x128xf32> to vector<8x128xf32>
    %c0_39 = arith.constant 0 : index
    %c0_40 = arith.constant 0 : index
    %51 = vector.load %arg4[%c0_39, %c0_40] : memref<8x128xf32, #tpu.memory_space<vmem>>, vector<8x128xf32>
    %52 = arith.addf %50, %51 : vector<8x128xf32>
    %c0_41 = arith.constant 0 : index
    %c0_42 = arith.constant 0 : index
    %c0_43 = arith.constant 0 : index
    %53 = vector.load %arg5[%c0_41, %c0_42, %c0_43] : memref<1x8x128xf32, #tpu.memory_space<vmem>>, vector<1x8x128xf32>
    %54 = vector.shape_cast %53 : vector<1x8x128xf32> to vector<8x128xf32>
    %55 = vector.shape_cast %52 : vector<8x128xf32> to vector<1x8x128xf32>
    tpu.vector_store %arg5[%c0_41, %c0_42, %c0_43], %55 {strides = array<i32>} : memref<1x8x128xf32, #tpu.memory_space<vmem>>, vector<1x8x128xf32>,
    return
  }
  func.func @transform_1(%arg0: i32, %arg1: i32, %arg2: memref<32xi32, #tpu.memory_space<smem>>) -> (i32, i32) {
    %c0_i32 = arith.constant 0 : i32
    %c0_i32_0 = arith.constant 0 : i32
    return %arg0, %c0_i32 : i32, i32
  }
  func.func @transform_2(%arg0: i32, %arg1: i32, %arg2: memref<32xi32, #tpu.memory_space<smem>>) -> (i32, i32, i32) {
    %c0_i32 = arith.constant 0 : i32
    %c0_i32_0 = arith.constant 0 : i32
    return %arg1, %arg0, %c0_i32 : i32, i32, i32
  }
}

</mosaic_0001>

<bundles_post_ra>
// kernel: tpu_custom_call.1
= control target key start
LH: loop header
LB: loop body
LE: loop exit
PB: predicated region body
PF: predicated region fallthrough
CT: control target
= control target key end

     0   :  { %s2495_s0 = inlined_call_operand.hbm [shape: s32[32], index: 0, kind: input, shape index: {}]   ;;  %s2496_s1 = inlined_call_operand.hbm [shape: f32[32,128], index: 1, kind: input, shape index: {}]   ;;  %s2497_s2 = inlined_call_operand.hbm [shape: f32[16,128], index: 2, kind: input, shape index: {}]   ;;  %s2498_s3 = inlined_call_operand.hbm [shape: f32[2,16,128], index: 3, kind: output, shape index: {}]  }
   0x1   :  { %2514 = sst [smem:[#allocation76_spill]] %s2497_s2  ;;  %s1023_s14 = scalar_lea.hbm %s2495_s0, 16 }
   0x2   :  { %2515 = sst [smem:[#allocation77_spill]] %s2498_s3  ;;  %p1024_p0 = scmp.ne.s32.totalorder %s2495_s0, %s1023_s14 }
   0x3   :  { %p1027_p1 = scmp.lt.u32.totalorder %s1023_s14, %s2495_s0 }
   0x5   :  { %p1029_p2 = pnand %p1027_p1, %p1024_p0 }
   0x7   :  { %1032 = shalt.err (!%p1029_p2)  }
   0x8   :  { %s1639_s19 = smov [#allocation5]  }
   0x9   :  { %9 = dma.hbm_to_smem %s2495_s0, 16, %s1639_s19, [#allocation4] }
   0xa   :  { %1583 = dma.done.wait [#allocation4], 16 }
   0xb   :  { %1584 = vsyncadd [#allocation4], 4294967280 }
   0xc   :  { %11 = sfence }
   0xd   :  { %12 = vsyncpa [#allocation7], 0 }
   0xe   :  { %14 = vsyncpa [#allocation7 + $0x1], 0 }
   0xf   :  { %15 = vsyncpa [#allocation8], 0 }
  0x10   :  { %17 = vsyncpa [#allocation8 + $0x1], 0  ;;  %s1682_s22 = smov 0   ;;  %s1684_s23 = smov 0  }
  0x11   :  { %s1686_s24 = smov 0   ;;  %s1688_s25 = smov 0  }
  0x12   :  { %s1690_s26 = smov 0   ;;  %s1692_s27 = smov 0  }
  0x13   :  { %s1694_s0 = smov 0   ;;  %s1696_s28 = smov 0  }
  0x14   :  { %s1698_s29 = smov 0   ;;  %s1700_s30 = smov 0  }
  0x15   :  { %s1702_s4 = smov 0  }
  0x16 LB: > { %2516 = sst [smem:[#allocation64_spill]] %s1597_s22  ;;  %s698_s5 = sadd.s32 4294967295, %s1637_s4   ;;  %s1637_s4 = sphi %s1702_s4, %s23_s4   ;;  %s1633_s30 = sphi %s1700_s30, %s2600_s30   ;;  %s1629_s29 = sphi %s1698_s29, %s2599_s29   ;;  %s1625_s28 = sphi %s1696_s28, %s2598_s28   ;;  %s1621_s0 = sphi %s1694_s0, %s2597_s0   ;;  %s1617_s27 = sphi %s1692_s27, %s2596_s27   ;;  %s1613_s26 = sphi %s1690_s26, %s2595_s26   ;;  %s1609_s25 = sphi %s1688_s25, %s2594_s25   ;;  %s1605_s24 = sphi %s1686_s24, %s2593_s24   ;;  %s1601_s23 = sphi %s1684_s23, %s2602_s23   ;;  %s1597_s22 = sphi %s1682_s22, %s2601_s22  }
  0x17   : > { %2517 = sst [smem:[#allocation65_spill]] %s1605_s24  ;;  %s699_s6 = sadd.s32 4294967294, %s1637_s4  }
  0x18   : > { %2518 = sst [smem:[#allocation66_spill]] %s1613_s26  ;;  %s32_s7 = sadd.s32 1, %s1629_s29 }
  0x19   : > { %2519 = sst [smem:[#allocation67_spill]] %s1617_s27  ;;  %s35_s8 = sadd.s32 1, %s1633_s30 }
  0x1a   : > { %2520 = sst [smem:[#allocation68_spill]] %s1629_s29  ;;  %p33_p3 = scmp.ge.s32.totalorder %s32_s7, 2 }
  0x1b   : > { %2521 = sst [smem:[#allocation69_spill]] %s1633_s30  ;;  %s42_s9 = sadd.s32 1, %s1617_s27 }
  0x1c   : > { %2522 = sst [smem:[#allocation70_spill]] %s1637_s4  ;;  %p49_p4 = scmp.ne.s32.totalorder %s1617_s27, %s1613_s26 }
  0x1d   : > { %p50_p5 = scmp.eq.s32.totalorder %s1637_s4, 0  ;;  %s2604_s7 = smov (%p33_p3, %s32_s7), 0 }
  0x1e   : > { %2523 = sst [smem:[#allocation71_spill]] %s2604_s7  ;;  %s2606_s8 = smov (!%p33_p3, %s35_s8), %s1633_s30 }
  0x1f   : > { %p1746_p6 = por %p50_p5, %p49_p4  ;;  %p55_p7 = scmp.ne.s32.totalorder %s1613_s26, %s1609_s25 }
  0x20   : > { %p37_p8 = scmp.ge.s32.totalorder %s2606_s8, 2  ;;  %p56_p9 = scmp.eq.s32.totalorder %s698_s5, 0 }
  0x21   : > { %s65_s11 = ssub.s32 %s1629_s29, %s2604_s7  ;;  %s70_s12 = sadd.s32 1, %s1605_s24 }
  0x22   : > { %s2608_s8 = smov (%p37_p8, %s2606_s8), 0  ;;  %p1756_p10 = por %p56_p9, %p55_p7 }
  0x23   : > { %2525 = sst [smem:[#allocation72_spill]] %s2608_s8  ;;  %p80_p11 = scmp.ne.s32.totalorder %s1605_s24, %s1601_s23 }
  0x24   : > { %s39_s14 = ssub.s32 %s1633_s30, %s2608_s8  ;;  %p81_p12 = scmp.eq.s32.totalorder %s698_s5, 3 }
  0x25   : > { %p40_p13 = scmp.eq.s32.totalorder %s39_s14, 0  ;;  %s67_s15 = sor.u32 %s65_s11, %s39_s14 }
  0x26   : > { %p68_p0 = scmp.eq.s32.totalorder %s67_s15, 0  ;;  %p1764_p1 = por %p81_p12, %p80_p11 }
  0x27   : > { %s1769_s17 = scalar_select %p40_p13, %s1617_s27, %s42_s9  }
  0x28   : > { %s2527_s16 = scalar_select %p1764_p1, 1, 0 }
  0x29   : > { %2528 = sst [smem:[#allocation73_spill]] %s1769_s17  ;;  %p86_p2 = scmp.ne.s32.totalorder %s1601_s23, %s1597_s22 }
  0x2a   : > { %s1772_s18 = scalar_select %p68_p0, %s1605_s24, %s70_s12  }
  0x2b   : > { %p87_p3 = scmp.eq.s32.totalorder %s699_s6, 3  ;;  %p922_p4 = scmp.lt.s32.totalorder %s1637_s4, 4 }
  0x2c   : > { %2529 = sst [smem:[#allocation74_spill]] %s1772_s18  ;;  %s107_s20 = sand.u32 1, %s1617_s27  }
  0x2d   : > { %p1777_p5 = por %p87_p3, %p86_p2  ;;  %s702_s21 = sshll.u32 %s107_s20, 3 }
  0x2e   : > { %s703_s25 = sshll.u32 %s1633_s30, 7  ;;  %s2532_s2 = sld [smem:[#allocation76_spill]] }
  0x2f   : > { %s2530_s19 = scalar_select %p1777_p5, 1, 0 }
  0x30   : > { %s111_s9 = scalar_lea.vmem [#allocation6], %s702_s21  ;;  %p1792_p7 = pnand %p922_p4, %p1746_p6 }
  0x31   : > { %2531 = sst [smem:[#allocation75_spill]] %s2530_s19  ;;  %s118_s12 = sshll.u32 %s111_s9, 4  ;;  %s1788_s12 = int_to_ptr.vmem [resolvable:$true] %s118_s12 }
  0x32   : > { %s108_s15 = scalar_lea.sflag [#allocation7], %s107_s20  ;;  %p1035_p12 = pneg %p1792_p7 }
  0x34   : > { %s1786_s14 = scalar_lea.hbm %s2532_s2, %s703_s25  ;;  %s1038_s10 = scalar_lea.hbm %s2532_s2, 256 }
  0x35   : > { %s1033_s25 = scalar_lea.hbm %s1786_s14, 128  ;;  %p1039_p6 = scmp.lt.u32.totalorder %s1786_s14, %s2532_s2 }
  0x36   : > { %p1034_p11 = scmp.ne.s32.totalorder %s1786_s14, %s1033_s25  ;;  %p1040_p2 = scmp.lt.u32.totalorder %s1038_s10, %s1033_s25 }
  0x37   : > { %p1042_p4 = scmp.lt.u32.totalorder %s1033_s25, %s1786_s14 }
  0x38   : > { %p1036_p13 = pnand %p1035_p12, %p1034_p11  ;;  %p1041_p3 = por %p1040_p2, %p1039_p6 }
  0x3a   : > { %p1037_p0 = pneg %p1036_p13  ;;  %p1043_p8 = por %p1042_p4, %p1041_p3 }
  0x3c   : > { %p1044_p9 = pnand %p1043_p8, %p1037_p0 }
  0x3e   : > { %1047 = shalt.err (!%p1044_p9)
}
  0x3f   : > { %s1048_s20 = scalar_lea.vmem %s1788_s12, 128  ;;  %s1640_s21 = smov [#allocation6]  }
  0x40   : > { %p1049_p11 = scmp.ne.s32.totalorder %s1788_s12, %s1048_s20  ;;  %s1053_s5 = sshll.u32 %s1640_s21, 4  ;;  %s1054_s5 = int_to_ptr.vmem [resolvable:$false] %s1053_s5 }
  0x41   : > { %s1055_s11 = scalar_lea.vmem %s1054_s5, 256  ;;  %p1056_p1 = scmp.lt.s32.totalorder %s1788_s12, %s1054_s5 }
  0x42   : > { %p1051_p13 = pnand %p1049_p11, %p1035_p12  ;;  %p1057_p6 = scmp.lt.s32.totalorder %s1055_s11, %s1048_s20 }
  0x44   : > { %p1052_p5 = pneg %p1051_p13  ;;  %p1058_p2 = por %p1057_p6, %p1056_p1 }
  0x46   : > { %p1059_p3 = pnand %p1058_p2, %p1052_p5 }
  0x48   : > { %1062 = shalt.err (!%p1059_p3)
}
  0x49   : > { %917 = dma.hbm_to_vmem [thread:$0]  (!%p1792_p7), %s1786_s14, 128, %s1788_s12, %s108_s15  }
  0x4a   : > { %p2534_p8 = scmp.lt.s32.totalorder %s1637_s4, 5  ;;  %p2535_p9 = scmp.ge.s32.totalorder %s1637_s4, 1 }
  0x4c   : > { %p124_p12 = pnand %p2535_p9, %p2534_p8 }
  0x4d   : > { %s129_s25 = sand.u32 (!%p124_p12), 1, %s1613_s26  }
  0x4e   : > { %127 = sbr.rel (%p124_p12) target bundleno = 601 (0x259), region = 24  ;;  %s1828_s10 = sshll.u32 (!%p124_p12), %s129_s25, 3 }
  0x4f   : > { %s130_s9 = scalar_lea.sflag (!%p124_p12), [#allocation7], %s129_s25 }
  0x55   : > { %1586 = dma.done.wait (%p1756_p10), %s130_s9, 128  }
  0x56   : > { %1588 = vsyncadd (%p1756_p10), %s130_s9, 4294967168  ;;  %s2500_s14 = sand.u32 1, %s1601_s23   ;;  %p152_p1 = scmp.lt.s32.totalorder %s1621_s0, 0 }
  0x57   : > { %s1839_s12 = sshll.u32 %s2500_s14, 3  ;;  %s153_s6 = ssub.s32 0, %s1621_s0 }
  0x58   : > { %s707_s15 = smin.u32 %s1621_s0, %s153_s6  ;;  %p923_p10 = scmp.eq.s32.totalorder %s1621_s0, 0 }
  0x59   : > { %s155_s13 = sand.u32 1, %s707_s15   ;;  %s1847_s5 = sshll.u32 %s1625_s28, 3 }
  0x5a   : > { %s156_s21 = ssub.s32 0, %s155_s13  ;;  %s1641_s9 = smov [#allocation2]  }
  0x5b   : > { %s2610_s21 = smov (!%p152_p1, %s156_s21), %s155_s13  ;;  %s177_s14 = sshll.u32 %s1641_s9, 4  ;;  %s1855_s14 = int_to_ptr.vmem [resolvable:$true] %s177_s14 }
  0x5c   : > { %s863_s11 = scalar_select %p923_p10, [#allocation5], [#allocation44] }
  0x5d   : > { %s864_s25 = scalar_select %p923_p10, %s1847_s5, 0 }
  0x5e   : > { %s181_s20 = sadd.s32 1, %s1847_s5  ;;  %s201_s13 = sadd.s32 2, %s1847_s5 }
  0x5f   : > { %s163_s6 = sld [smem:[%s863_s11 + %s864_s25]]  ;;  %s2612_s20 = smov (!%p923_p10, %s181_s20), 0 }
  0x60   : > { %s866_s15 = scalar_select %p923_p10, [#allocation5], [#allocation45] }
  0x61   : > { %s1642_s8 = smov [#allocation2 + $0x1]   ;;  %s2616_s13 = smov (!%p923_p10, %s201_s13), 0 }
  0x62   : > { %s1862_s2 = sld [smem:[%s866_s15 + %s2612_s20]]  ;;  %s197_s7 = sshll.u32 %s1642_s8, 4  ;;  %s1864_s7 = int_to_ptr.vmem [resolvable:$true] %s197_s7 }
  0x63   : > { %s869_s11 = scalar_select %p923_p10, [#allocation5], [#allocation46] }
  0x64   : > { %s1643_s30 = smov [#allocation2 + $0x2]   ;;  %s1882_s18 = scalar_lea.hbm %s2496_s1, 512 }
  0x65   : > { %p164_p5 = scmp.gt.s32.totalorder %s163_s6, 0  ;;  %p710_p7 = scmp.lt.s32.totalorder %s163_s6, 31 }
  0x66   : > { %s1872_s20 = sld [smem:[%s869_s11 + %s2616_s13]]  ;;  %s217_s29 = sshll.u32 %s1643_s30, 4  ;;  %s1904_s29 = int_to_ptr.vmem [resolvable:$true] %s217_s29 }
  0x67   : > { %s2614_s6 = smov (!%p164_p5, %s163_s6), 0 }
  0x68   : > { %s2618_s6 = smov (!%p710_p7, %s2614_s6), 31  ;;  %p183_p0 = scmp.gt.s32.totalorder %s1862_s2, 0 }
  0x69   : > { %p716_p4 = scmp.lt.s32.totalorder %s1862_s2, 31  ;;  %s715_s25 = sshll.u32 %s2618_s6, 4 }
  0x6a   : > { %s169_s8 = scalar_lea.hbm %s2496_s1, %s715_s25 }
  0x6b   : > { %s1063_s17 = scalar_lea.hbm %s169_s8, 16  ;;  %p1068_p2 = scmp.lt.u32.totalorder %s169_s8, %s2496_s1 }
  0x6c   : > { %p1064_p11 = scmp.ne.s32.totalorder %s169_s8, %s1063_s17  ;;  %p1069_p3 = scmp.lt.u32.totalorder %s1882_s18, %s1063_s17 }
  0x6d   : > { %p1071_p9 = scmp.lt.u32.totalorder %s1063_s17, %s169_s8 }
  0x6e   : > { %p1065_p13 = pnand %p1064_p11, %p923_p10  ;;  %p1070_p8 = por %p1069_p3, %p1068_p2 }
  0x70   : > { %p1066_p6 = pneg %p1065_p13  ;;  %p1072_p12 = por %p1071_p9, %p1070_p8 }
  0x72   : > { %p1073_p1 = pnand %p1072_p12, %p1066_p6 }
  0x74   : > { %1076 = shalt.err (!%p1073_p1)  }
  0x75   : > { %s1077_s30 = scalar_lea.vmem %s1855_s14, 16  ;;  %s1893_s26 = scalar_lea.vmem %s1855_s14, 256 }
  0x76   : > { %p1078_p5 = scmp.ne.s32.totalorder %s1855_s14, %s1077_s30  ;;  %p1084_p13 = scmp.lt.s32.totalorder %s1855_s14, %s1855_s14 }
  0x77   : > { %p1085_p2 = scmp.lt.s32.totalorder %s1893_s26, %s1077_s30 }
  0x78   : > { %p1079_p7 = pnand %p1078_p5, %p923_p10 }
  0x79   : > { %p1086_p3 = por %p1085_p2, %p1084_p13 }
  0x7a   : > { %p1080_p11 = pneg %p1079_p7 }
  0x7c   : > { %p1087_p8 = pnand %p1086_p3, %p1080_p11 }
  0x7e   : > { %1090 = shalt.err (!%p1087_p8)  }
  0x7f   : > { %865 = dma.hbm_to_vmem [thread:$0]  (%p923_p10), %s169_s8, 16, %s1855_s14, [#allocation3] }
  0x80   : > { %s184_s24 = scalar_select %p183_p0, %s1862_s2, 0 }
  0x81   : > { %s221_s27 = sadd.s32 3, %s1847_s5  ;;  %s1644_s9 = smov [#allocation2 + $0x3]  }
  0x82   : > { %s2620_s24 = smov (!%p716_p4, %s184_s24), 31  ;;  %s237_s15 = sshll.u32 %s1644_s9, 4  ;;  %s1941_s15 = int_to_ptr.vmem [resolvable:$true] %s237_s15 }
  0x83   : > { %s721_s17 = sshll.u32 %s2620_s24, 4 }
  0x84   : > { %s188_s25 = scalar_lea.hbm %s2496_s1, %s721_s17 }
  0x85   : > { %s1091_s6 = scalar_lea.hbm %s188_s25, 16  ;;  %p1096_p0 = scmp.lt.u32.totalorder %s188_s25, %s2496_s1 }
  0x86   : > { %p1092_p12 = scmp.ne.s32.totalorder %s188_s25, %s1091_s6  ;;  %p1097_p7 = scmp.lt.u32.totalorder %s1882_s18, %s1091_s6 }
  0x87   : > { %p1099_p11 = scmp.lt.u32.totalorder %s1091_s6, %s188_s25 }
  0x88   : > { %p1093_p1 = pnand %p1092_p12, %p923_p10  ;;  %p1098_p4 = por %p1097_p7, %p1096_p0 }
  0x8a   : > { %p1094_p5 = pneg %p1093_p1  ;;  %p1100_p13 = por %p1099_p11, %p1098_p4 }
  0x8c   : > { %p1101_p2 = pnand %p1100_p13, %p1094_p5 }
  0x8e   : > { %1104 = shalt.err (!%p1101_p2)  }
  0x8f   : > { %s1105_s2 = scalar_lea.vmem %s1864_s7, 16  ;;  %p1112_p1 = scmp.lt.s32.totalorder %s1864_s7, %s1855_s14 }
  0x90   : > { %p1106_p3 = scmp.ne.s32.totalorder %s1864_s7, %s1105_s2  ;;  %p1113_p9 = scmp.lt.s32.totalorder %s1893_s26, %s1105_s2 }
  0x92   : > { %p1107_p8 = pnand %p1106_p3, %p923_p10  ;;  %p1114_p6 = por %p1113_p9, %p1112_p1 }
  0x94   : > { %p1108_p12 = pneg %p1107_p8 }
  0x96   : > { %p1115_p0 = pnand %p1114_p6, %p1108_p12 }
  0x98   : > { %1118 = shalt.err (!%p1115_p0)  }
  0x99   : > { %868 = dma.hbm_to_vmem [thread:$0]  (%p923_p10), %s188_s25, 16, %s1864_s7, [#allocation3] }
  0x9a   : > { %p2536_p5 = scmp.gt.s32.totalorder %s1872_s20, 0  ;;  %p2537_p7 = scmp.lt.s32.totalorder %s1872_s20, 31 }
  0x9b   : > { %s872_s17 = scalar_select %p923_p10, [#allocation5], [#allocation47] }
  0x9c   : > { %s204_s24 = scalar_select %p2536_p5, %s1872_s20, 0 }
  0x9d   : > { %s2624_s27 = smov (!%p923_p10, %s221_s27), 0 }
  0x9e   : > { %s2622_s24 = smov (!%p2537_p7, %s204_s24), 31  ;;  %s1946_s8 = sld [smem:[%s872_s17 + %s2624_s27]] }
  0x9f   : > { %s727_s13 = sshll.u32 %s2622_s24, 4 }
  0xa0   : > { %s208_s6 = scalar_lea.hbm %s2496_s1, %s727_s13 }
  0xa1   : > { %s1119_s30 = scalar_lea.hbm %s208_s6, 16  ;;  %p1124_p11 = scmp.lt.u32.totalorder %s208_s6, %s2496_s1 }
  0xa2   : > { %p1120_p6 = scmp.ne.s32.totalorder %s208_s6, %s1119_s30  ;;  %p1125_p13 = scmp.lt.u32.totalorder %s1882_s18, %s1119_s30 }
  0xa3   : > { %p1127_p3 = scmp.lt.u32.totalorder %s1119_s30, %s208_s6 }
  0xa4   : > { %p1121_p9 = pnand %p1120_p6, %p923_p10  ;;  %p1126_p2 = por %p1125_p13, %p1124_p11 }
  0xa6   : > { %p1122_p4 = pneg %p1121_p9  ;;  %p1128_p8 = por %p1127_p3, %p1126_p2 }
  0xa8   : > { %p1129_p12 = pnand %p1128_p8, %p1122_p4 }
  0xaa   : > { %1132 = shalt.err (!%p1129_p12)  }
  0xab   : > { %s1133_s27 = scalar_lea.vmem %s1904_s29, 16  ;;  %p1140_p7 = scmp.lt.s32.totalorder %s1904_s29, %s1855_s14 }
  0xac   : > { %p1134_p1 = scmp.ne.s32.totalorder %s1904_s29, %s1133_s27  ;;  %p1141_p6 = scmp.lt.s32.totalorder %s1893_s26, %s1133_s27 }
  0xae   : > { %p1135_p0 = pnand %p1134_p1, %p923_p10  ;;  %p1142_p9 = por %p1141_p6, %p1140_p7 }
  0xb0   : > { %p1136_p5 = pneg %p1135_p0 }
  0xb2   : > { %p1143_p11 = pnand %p1142_p9, %p1136_p5 }
  0xb4   : > { %1146 = shalt.err (!%p1143_p11)  }
  0xb5   : > { %871 = dma.hbm_to_vmem [thread:$0]  (%p923_p10), %s208_s6, 16, %s1904_s29, [#allocation3] }
  0xb6   : > { %s241_s25 = sadd.s32 4, %s1847_s5  ;;  %s1645_s24 = smov [#allocation2 + $0x4]  }
  0xb7   : > { %s875_s2 = scalar_select %p923_p10, [#allocation5], [#allocation48] }
  0xb8   : > { %s2626_s25 = smov (!%p923_p10, %s241_s25), 0  ;;  %s257_s17 = sshll.u32 %s1645_s24, 4  ;;  %s1974_s17 = int_to_ptr.vmem [resolvable:$true] %s257_s17 }
  0xb9   : > { %s261_s13 = sadd.s32 5, %s1847_s5  ;;  %p223_p4 = scmp.gt.s32.totalorder %s1946_s8, 0 }
  0xba   : > { %p728_p13 = scmp.lt.s32.totalorder %s1946_s8, 31  ;;  %s1972_s11 = sld [smem:[%s875_s2 + %s2626_s25]] }
  0xbb   : > { %s2628_s8 = smov (!%p223_p4, %s1946_s8), 0  ;;  %s2632_s13 = smov (!%p923_p10, %s261_s13), 0 }
  0xbc   : > { %s1979_s29 = scalar_select %p923_p10, [#allocation5], [#allocation49] }
  0xbd   : > { %s2630_s8 = smov (!%p728_p13, %s2628_s8), 31 }
  0xbe   : > { %s733_s9 = sshll.u32 %s2630_s8, 4 }
  0xbf   : > { %s228_s7 = scalar_lea.hbm %s2496_s1, %s733_s9 }
  0xc0   : > { %s1147_s20 = scalar_lea.hbm %s228_s7, 16  ;;  %p1152_p1 = scmp.lt.u32.totalorder %s228_s7, %s2496_s1 }
  0xc1   : > { %p1148_p3 = scmp.ne.s32.totalorder %s228_s7, %s1147_s20  ;;  %p1153_p0 = scmp.lt.u32.totalorder %s1882_s18, %s1147_s20 }
  0xc2   : > { %p1155_p7 = scmp.lt.u32.totalorder %s1147_s20, %s228_s7 }
  0xc3   : > { %p1149_p8 = pnand %p1148_p3, %p923_p10  ;;  %p1154_p5 = por %p1153_p0, %p1152_p1 }
  0xc5   : > { %p1150_p12 = pneg %p1149_p8  ;;  %p1156_p6 = por %p1155_p7, %p1154_p5 }
  0xc7   : > { %p1157_p9 = pnand %p1156_p6, %p1150_p12 }
  0xc9   : > { %1160 = shalt.err (!%p1157_p9)  }
  0xca   : > { %s1161_s8 = scalar_lea.vmem %s1941_s15, 16  ;;  %p1168_p3 = scmp.lt.s32.totalorder %s1941_s15, %s1855_s14 }
  0xcb   : > { %p1162_p11 = scmp.ne.s32.totalorder %s1941_s15, %s1161_s8  ;;  %p1169_p8 = scmp.lt.s32.totalorder %s1893_s26, %s1161_s8 }
  0xcd   : > { %p1163_p4 = pnand %p1162_p11, %p923_p10  ;;  %p1170_p2 = por %p1169_p8, %p1168_p3 }
  0xcf   : > { %p1164_p13 = pneg %p1163_p4 }
  0xd1   : > { %p1171_p0 = pnand %p1170_p2, %p1164_p13 }
  0xd3   : > { %1174 = shalt.err (!%p1171_p0)  }
  0xd4   : > { %874 = dma.hbm_to_vmem [thread:$0]  (%p923_p10), %s228_s7, 16, %s1941_s15, [#allocation3] }
  0xd5   : > { %p2538_p12 = scmp.gt.s32.totalorder %s1972_s11, 0  ;;  %p734_p1 = scmp.lt.s32.totalorder %s1972_s11, 31 }
  0xd6   : > { %s2008_s24 = sld [smem:[%s1979_s29 + %s2632_s13]]  ;;  %s1646_s9 = smov [#allocation2 + $0x5]  }
  0xd7   : > { %s244_s2 = scalar_select %p2538_p12, %s1972_s11, 0 }
  0xd8   : > { %s277_s6 = sshll.u32 %s1646_s9, 4  ;;  %s281_s30 = sadd.s32 6, %s1847_s5  ;;  %s2011_s6 = int_to_ptr.vmem [resolvable:$true] %s277_s6 }
  0xd9   : > { %s2634_s2 = smov (!%p734_p1, %s244_s2), 31  ;;  %s1647_s27 = smov [#allocation2 + $0x6]  }
  0xda   : > { %s739_s20 = sshll.u32 %s2634_s2, 4  ;;  %s297_s25 = sshll.u32 %s1647_s27, 4  ;;  %s2016_s25 = int_to_ptr.vmem [resolvable:$true] %s297_s25 }
  0xdb   : > { %s248_s15 = scalar_lea.hbm %s2496_s1, %s739_s20 }
  0xdc   : > { %s1175_s7 = scalar_lea.hbm %s248_s15, 16  ;;  %p1180_p6 = scmp.lt.u32.totalorder %s248_s15, %s2496_s1 }
  0xdd   : > { %p1176_p2 = scmp.ne.s32.totalorder %s248_s15, %s1175_s7  ;;  %p1181_p9 = scmp.lt.u32.totalorder %s1882_s18, %s1175_s7 }
  0xde   : > { %p1183_p4 = scmp.lt.u32.totalorder %s1175_s7, %s248_s15 }
  0xdf   : > { %p1177_p5 = pnand %p1176_p2, %p923_p10  ;;  %p1182_p11 = por %p1181_p9, %p1180_p6 }
  0xe1   : > { %p1178_p7 = pneg %p1177_p5  ;;  %p1184_p13 = por %p1183_p4, %p1182_p11 }
  0xe3   : > { %p1185_p3 = pnand %p1184_p13, %p1178_p7 }
  0xe5   : > { %1188 = shalt.err (!%p1185_p3)  }
  0xe6   : > { %s1189_s19 = scalar_lea.vmem %s1974_s17, 16  ;;  %p1196_p1 = scmp.lt.s32.totalorder %s1974_s17, %s1855_s14 }
  0xe7   : > { %p1190_p8 = scmp.ne.s32.totalorder %s1974_s17, %s1189_s19  ;;  %p1197_p2 = scmp.lt.s32.totalorder %s1893_s26, %s1189_s19 }
  0xe9   : > { %p1191_p0 = pnand %p1190_p8, %p923_p10  ;;  %p1198_p5 = por %p1197_p2, %p1196_p1 }
  0xeb   : > { %p1192_p12 = pneg %p1191_p0 }
  0xed   : > { %p1199_p6 = pnand %p1198_p5, %p1192_p12 }
  0xef   : > { %1202 = shalt.err (!%p1199_p6)  }
  0xf0   : > { %877 = dma.hbm_to_vmem [thread:$0]  (%p923_p10), %s248_s15, 16, %s1974_s17, [#allocation3] }
  0xf1   : > { %p263_p7 = scmp.gt.s32.totalorder %s2008_s24, 0  ;;  %p740_p9 = scmp.lt.s32.totalorder %s2008_s24, 31 }
  0xf2   : > { %s881_s29 = scalar_select %p923_p10, [#allocation5], [#allocation50] }
  0xf3   : > { %s2636_s24 = smov (!%p263_p7, %s2008_s24), 0  ;;  %s2638_s30 = smov (!%p923_p10, %s281_s30), 0 }
  0xf4   : > { %s2640_s24 = smov (!%p740_p9, %s2636_s24), 31  ;;  %s2043_s2 = sld [smem:[%s881_s29 + %s2638_s30]] }
  0xf5   : > { %s301_s9 = sadd.s32 7, %s1847_s5  ;;  %s745_s20 = sshll.u32 %s2640_s24, 4 }
  0xf6   : > { %s268_s7 = scalar_lea.hbm %s2496_s1, %s745_s20  ;;  %s1648_s13 = smov [#allocation2 + $0x7]  }
  0xf7   : > { %s317_s17 = sshll.u32 %s1648_s13, 4  ;;  %s1203_s15 = scalar_lea.hbm %s268_s7, 16  ;;  %s2073_s17 = int_to_ptr.vmem [resolvable:$true] %s317_s17 }
  0xf8   : > { %p1204_p11 = scmp.ne.s32.totalorder %s268_s7, %s1203_s15  ;;  %p1208_p3 = scmp.lt.u32.totalorder %s268_s7, %s2496_s1 }
  0xf9   : > { %p1209_p8 = scmp.lt.u32.totalorder %s1882_s18, %s1203_s15  ;;  %p1211_p12 = scmp.lt.u32.totalorder %s1203_s15, %s268_s7 }
  0xfa   : > { %p1205_p4 = pnand %p1204_p11, %p923_p10 }
  0xfb   : > { %p1210_p0 = por %p1209_p8, %p1208_p3 }
  0xfc   : > { %p1206_p13 = pneg %p1205_p4 }
  0xfd   : > { %p1212_p1 = por %p1211_p12, %p1210_p0 }
  0xff   : > { %p1213_p2 = pnand %p1212_p1, %p1206_p13 }
 0x101   : > { %1216 = shalt.err (!%p1213_p2)  }
 0x102   : > { %s1217_s5 = scalar_lea.vmem %s2011_s6, 16  ;;  %p1224_p9 = scmp.lt.s32.totalorder %s2011_s6, %s1855_s14 }
 0x103   : > { %p1218_p5 = scmp.ne.s32.totalorder %s2011_s6, %s1217_s5  ;;  %p1225_p11 = scmp.lt.s32.totalorder %s1893_s26, %s1217_s5 }
 0x105   : > { %p1219_p6 = pnand %p1218_p5, %p923_p10  ;;  %p1226_p4 = por %p1225_p11, %p1224_p9 }
 0x107   : > { %p1220_p7 = pneg %p1219_p6 }
 0x109   : > { %p1227_p3 = pnand %p1226_p4, %p1220_p7 }
 0x10b   : > { %1230 = shalt.err (!%p1227_p3)  }
 0x10c   : > { %880 = dma.hbm_to_vmem [thread:$0]  (%p923_p10), %s268_s7, 16, %s2011_s6, [#allocation3] }
 0x10d   : > { %s884_s24 = scalar_select %p923_p10, [#allocation5], [#allocation51] }
 0x10e   : > { %s2642_s9 = smov (!%p923_p10, %s301_s9), 0  ;;  %p283_p13 = scmp.gt.s32.totalorder %s2043_s2, 0 }
 0x10f   : > { %p746_p8 = scmp.lt.s32.totalorder %s2043_s2, 31  ;;  %s2071_s30 = sld [smem:[%s884_s24 + %s2642_s9]] }
 0x110   : > { %s2644_s2 = smov (!%p283_p13, %s2043_s2), 0  ;;  %s2077_s29 = sadd.s32 1, %s1621_s0 }
 0x111   : > { %s2509_s20 = sshll.u32 %s1621_s0, 1  ;;  %s2646_s2 = smov (!%p746_p8, %s2644_s2), 31 }
 0x112   : > { %s751_s6 = sshll.u32 %s2646_s2, 4 }
 0x113   : > { %s288_s7 = scalar_lea.hbm %s2496_s1, %s751_s6 }
 0x114   : > { %s1231_s9 = scalar_lea.hbm %s288_s7, 16  ;;  %p1236_p7 = scmp.lt.u32.totalorder %s288_s7, %s2496_s1 }
 0x115   : > { %p1232_p2 = scmp.ne.s32.totalorder %s288_s7, %s1231_s9  ;;  %p1237_p9 = scmp.lt.u32.totalorder %s1882_s18, %s1231_s9 }
 0x116   : > { %p1239_p4 = scmp.lt.u32.totalorder %s1231_s9, %s288_s7 }
 0x117   : > { %p1233_p5 = pnand %p1232_p2, %p923_p10  ;;  %p1238_p11 = por %p1237_p9, %p1236_p7 }
 0x119   : > { %p1234_p6 = pneg %p1233_p5  ;;  %p1240_p3 = por %p1239_p4, %p1238_p11 }
 0x11b   : > { %p1241_p13 = pnand %p1240_p3, %p1234_p6 }
 0x11d   : > { %1244 = shalt.err (!%p1241_p13)  }
 0x11e   : > { %s1245_s2 = scalar_lea.vmem %s2016_s25, 16  ;;  %p1252_p0 = scmp.lt.s32.totalorder %s2016_s25, %s1855_s14 }
 0x11f   : > { %p1246_p8 = scmp.ne.s32.totalorder %s2016_s25, %s1245_s2  ;;  %p1253_p12 = scmp.lt.s32.totalorder %s1893_s26, %s1245_s2 }
 0x121   : > { %p1247_p2 = pnand %p1246_p8, %p923_p10  ;;  %p1254_p1 = por %p1253_p12, %p1252_p0 }
 0x123   : > { %p1248_p5 = pneg %p1247_p2 }
 0x125   : > { %p1255_p7 = pnand %p1254_p1, %p1248_p5 }
 0x127   : > { %1258 = shalt.err (!%p1255_p7)  }
 0x128   : > { %883 = dma.hbm_to_vmem [thread:$0]  (%p923_p10), %s288_s7, 16, %s2016_s25, [#allocation3] }
 0x129   : > { %p2539_p6 = scmp.gt.s32.totalorder %s2071_s30, 0  ;;  %p752_p9 = scmp.lt.s32.totalorder %s2071_s30, 31 }
 0x12a   : > { %s327_s19 = ssub.s32 0, %s2077_s29  ;;  %s843_s24 = sadd.s32 2, %s2509_s20 }
 0x12b   : > { %s304_s11 = scalar_select %p2539_p6, %s2071_s30, 0 }
 0x12c   : > { %s2108_s5 = smin.u32 %s327_s19, %s2077_s29  ;;  %s333_s27 = sadd.s32 %s1625_s28, %s843_s24 }
 0x12d   : > { %s2648_s11 = smov (!%p752_p9, %s304_s11), 31  ;;  %s329_s6 = sand.u32 1, %s2108_s5  }
 0x12e   : > { %s757_s8 = sshll.u32 %s2648_s11, 4  ;;  %s330_s9 = ssub.s32 0, %s329_s6 }
 0x12f   : > { %s308_s2 = scalar_lea.hbm %s2496_s1, %s757_s8  ;;  %s2117_s25 = sshll.u32 %s333_s27, 3 }
 0x130   : > { %s1259_s7 = scalar_lea.hbm %s308_s2, 16  ;;  %p1264_p11 = scmp.lt.u32.totalorder %s308_s2, %s2496_s1 }
 0x131   : > { %p1260_p0 = scmp.ne.s32.totalorder %s308_s2, %s1259_s7  ;;  %p1265_p4 = scmp.lt.u32.totalorder %s1882_s18, %s1259_s7 }
 0x132   : > { %p1267_p13 = scmp.lt.u32.totalorder %s1259_s7, %s308_s2 }
 0x133   : > { %p1261_p12 = pnand %p1260_p0, %p923_p10  ;;  %p1266_p3 = por %p1265_p4, %p1264_p11 }
 0x135   : > { %p1262_p1 = pneg %p1261_p12  ;;  %p1268_p8 = por %p1267_p13, %p1266_p3 }
 0x137   : > { %p1269_p2 = pnand %p1268_p8, %p1262_p1 }
 0x139   : > { %1272 = shalt.err (!%p1269_p2)  }
 0x13a   : > { %s1273_s11 = scalar_lea.vmem %s2073_s17, 16  ;;  %p1280_p9 = scmp.lt.s32.totalorder %s2073_s17, %s1855_s14 }
 0x13b   : > { %p1274_p5 = scmp.ne.s32.totalorder %s2073_s17, %s1273_s11  ;;  %p1281_p0 = scmp.lt.s32.totalorder %s1893_s26, %s1273_s11 }
 0x13d   : > { %p1275_p7 = pnand %p1274_p5, %p923_p10  ;;  %p1282_p12 = por %p1281_p0, %p1280_p9 }
 0x13f   : > { %p1276_p6 = pneg %p1275_p7 }
 0x141   : > { %p1283_p4 = pnand %p1282_p12, %p1276_p6 }
 0x143   : > { %1286 = shalt.err (!%p1283_p4)  }
 0x144   : > { %886 = dma.hbm_to_vmem [thread:$0]  (%p923_p10), %s308_s2, 16, %s2073_s17, [#allocation3] }
 0x145   : > { %p2540_p1 = scmp.lt.s32.totalorder %s2077_s29, 0  ;;  %p2541_p11 = scmp.lt.s32.totalorder %s2077_s29, 2 }
 0x146   : > { %s356_s13 = sadd.s32 1, %s2117_s25  ;;  %s377_s19 = sadd.s32 2, %s2117_s25 }
 0x147   : > { %s2650_s9 = smov (!%p2540_p1, %s330_s9), %s329_s6  ;;  %p2542_p3 = pmov %p2541_p11 }
 0x148   : > { %s888_s5 = scalar_select %p2541_p11, [#allocation5], [#allocation52] }
 0x149   : > { %s889_s24 = scalar_select %p2542_p3, %s2117_s25, 0 }
 0x14a   : > { %s768_s27 = sshll.u32 %s2650_s9, 3  ;;  %p2543_p10 = pmov %p2542_p3 }
 0x14b   : > { %s335_s8 = sld [smem:[%s888_s5 + %s889_s24]]  ;;  %s2143_s15 = scalar_lea.vmem [#allocation2], %s768_s27 }
 0x14c   : > { %s352_s7 = sshll.u32 %s2143_s15, 4  ;;  %s619_s30 = scalar_lea.vmem %s2143_s15, 1 [#allocation2]  ;;  %s2151_s7 = int_to_ptr.vmem [resolvable:$true] %s352_s7 }
 0x14d   : > { %s891_s17 = scalar_select %p2543_p10, [#allocation5], [#allocation53] }
 0x14e   : > { %p2544_p13 = pmov %p2542_p3  ;;  %s2153_s6 = sshll.u32 %s619_s30, 4  ;;  %s2199_s6 = int_to_ptr.vmem [resolvable:$true] %s2153_s6 }
 0x14f   : > { %p2545_p5 = pmov %p2542_p3  ;;  %p2546_p7 = pmov %p2542_p3 }
 0x150   : > { %s2652_s13 = smov (!%p2544_p13, %s356_s13), 0  ;;  %s624_s24 = scalar_lea.vmem %s2143_s15, 2 [#allocation2] }
 0x151   : > { %p336_p8 = scmp.gt.s32.totalorder %s335_s8, 0  ;;  %p762_p2 = scmp.lt.s32.totalorder %s335_s8, 31 }
 0x152   : > { %s2155_s2 = sld [smem:[%s891_s17 + %s2652_s13]]  ;;  %s2658_s19 = smov (!%p2546_p7, %s377_s19), 0 }
 0x153   : > { %s2654_s8 = smov (!%p336_p8, %s335_s8), 0  ;;  %s2171_s13 = scalar_lea.sflag [#allocation3], %s2650_s9 }
 0x154   : > { %s2160_s11 = scalar_select %p2545_p5, [#allocation5], [#allocation54] }
 0x155   : > { %s2656_s8 = smov (!%p762_p2, %s2654_s8), 31  ;;  %p2547_p0 = pmov %p2542_p3 }
 0x156   : > { %s767_s5 = sshll.u32 %s2656_s8, 4 }
 0x157   : > { %s341_s20 = scalar_lea.hbm %s2496_s1, %s767_s5 }
 0x158   : > { %s1287_s17 = scalar_lea.hbm %s341_s20, 16  ;;  %p1292_p1 = scmp.lt.u32.totalorder %s341_s20, %s2496_s1 }
 0x159   : > { %p1288_p9 = scmp.ne.s32.totalorder %s341_s20, %s1287_s17  ;;  %p1293_p11 = scmp.lt.u32.totalorder %s1882_s18, %s1287_s17 }
 0x15a   : > { %p1295_p10 = scmp.lt.u32.totalorder %s1287_s17, %s341_s20 }
 0x15b   : > { %p1289_p12 = pnand %p1288_p9, %p2547_p0  ;;  %p1294_p3 = por %p1293_p11, %p1292_p1 }
 0x15d   : > { %p1290_p4 = pneg %p1289_p12  ;;  %p1296_p13 = por %p1295_p10, %p1294_p3 }
 0x15f   : > { %p1297_p8 = pnand %p1296_p13, %p1290_p4 }
 0x161   : > { %1300 = shalt.err (!%p1297_p8)  }
 0x162   : > { %s1301_s9 = scalar_lea.vmem %s2151_s7, 16  ;;  %p2548_p5 = pmov %p2547_p0 }
 0x163   : > { %p1302_p2 = scmp.ne.s32.totalorder %s2151_s7, %s1301_s9  ;;  %p1308_p0 = scmp.lt.s32.totalorder %s2151_s7, %s1855_s14 }
 0x164   : > { %p1309_p12 = scmp.lt.s32.totalorder %s1893_s26, %s1301_s9 }
 0x165   : > { %p1303_p7 = pnand %p1302_p2, %p2548_p5 }
 0x166   : > { %p1310_p6 = por %p1309_p12, %p1308_p0 }
 0x167   : > { %p1304_p9 = pneg %p1303_p7 }
 0x169   : > { %p1311_p1 = pnand %p1310_p6, %p1304_p9 }
 0x16b   : > { %1314 = shalt.err (!%p1311_p1)  }
 0x16c   : > { %p2549_p11 = pmov %p2548_p5  ;;  %p2550_p4 = scmp.gt.s32.totalorder %s2155_s2, 0 }
 0x16d   : > { %p769_p3 = scmp.lt.s32.totalorder %s2155_s2, 31  ;;  %s2196_s4 = sld [smem:[%s2160_s11 + %s2658_s19]] }
 0x16e   : > { %890 = dma.hbm_to_vmem [thread:$0]  (%p2549_p11), %s341_s20, 16, %s2151_s7, %s2171_s13 }
 0x16f   : > { %s359_s22 = scalar_select %p2550_p4, %s2155_s2, 0 }
 0x170   : > { %s394_s8 = sshll.u32 %s624_s24, 4  ;;  %s398_s5 = sadd.s32 3, %s2117_s25  ;;  %s2203_s8 = int_to_ptr.vmem [resolvable:$true] %s394_s8 }
 0x171   : > { %s2660_s22 = smov (!%p769_p3, %s359_s22), 31  ;;  %s629_s27 = scalar_lea.vmem %s2143_s15, 3 [#allocation2] }
 0x172   : > { %s774_s30 = sshll.u32 %s2660_s22, 4  ;;  %s2208_s20 = sshll.u32 %s629_s27, 4  ;;  %s2270_s20 = int_to_ptr.vmem [resolvable:$true] %s2208_s20 }
 0x173   : > { %s363_s3 = scalar_lea.hbm %s2496_s1, %s774_s30  ;;  %p2551_p10 = pmov %p2548_p5 }
 0x174   : > { %s1315_s7 = scalar_lea.hbm %s363_s3, 16  ;;  %p1320_p2 = scmp.lt.u32.totalorder %s363_s3, %s2496_s1 }
 0x175   : > { %p1316_p6 = scmp.ne.s32.totalorder %s363_s3, %s1315_s7  ;;  %p1321_p5 = scmp.lt.u32.totalorder %s1882_s18, %s1315_s7 }
 0x176   : > { %p1323_p9 = scmp.lt.u32.totalorder %s1315_s7, %s363_s3 }
 0x177   : > { %p1317_p13 = pnand %p1316_p6, %p2551_p10  ;;  %p1322_p7 = por %p1321_p5, %p1320_p2 }
 0x179   : > { %p1318_p8 = pneg %p1317_p13  ;;  %p1324_p0 = por %p1323_p9, %p1322_p7 }
 0x17b   : > { %p1325_p12 = pnand %p1324_p0, %p1318_p8 }
 0x17d   : > { %1328 = shalt.err (!%p1325_p12)  }
 0x17e   : > { %s1329_s11 = scalar_lea.vmem %s2199_s6, 16  ;;  %p2552_p11 = pmov %p2551_p10 }
 0x17f   : > { %p1330_p1 = scmp.ne.s32.totalorder %s2199_s6, %s1329_s11  ;;  %p1336_p6 = scmp.lt.s32.totalorder %s2199_s6, %s1855_s14 }
 0x180   : > { %p1337_p10 = scmp.lt.s32.totalorder %s1893_s26, %s1329_s11 }
 0x181   : > { %p1331_p4 = pnand %p1330_p1, %p2552_p11 }
 0x182   : > { %p1338_p13 = por %p1337_p10, %p1336_p6 }
 0x183   : > { %p1332_p3 = pneg %p1331_p4 }
 0x185   : > { %p1339_p2 = pnand %p1338_p13, %p1332_p3 }
 0x187   : > { %1342 = shalt.err (!%p1339_p2)  }
 0x188   : > { %p2553_p5 = pmov %p2552_p11  ;;  %p379_p8 = scmp.gt.s32.totalorder %s2196_s4, 0 }
 0x189   : > { %p776_p7 = scmp.lt.s32.totalorder %s2196_s4, 31  ;;  %s419_s27 = sadd.s32 4, %s2117_s25 }
 0x18a   : > { %893 = dma.hbm_to_vmem [thread:$0]  (%p2553_p5), %s363_s3, 16, %s2199_s6, %s2171_s13 }
 0x18b   : > { %p2554_p9 = pmov %p2553_p5  ;;  %s2662_s4 = smov (!%p379_p8, %s2196_s4), 0 }
 0x18c   : > { %p2555_p0 = pmov %p2553_p5  ;;  %s2666_s4 = smov (!%p776_p7, %s2662_s4), 31 }
 0x18d   : > { %s897_s24 = scalar_select %p2554_p9, [#allocation5], [#allocation55] }
 0x18e   : > { %s2664_s5 = smov (!%p2555_p0, %s398_s5), 0  ;;  %s781_s30 = sshll.u32 %s2666_s4, 4 }
 0x18f   : > { %s2236_s22 = sld [smem:[%s897_s24 + %s2664_s5]]  ;;  %s634_s17 = scalar_lea.vmem %s2143_s15, 4 [#allocation2] }
 0x190   : > { %s384_s2 = scalar_lea.hbm %s2496_s1, %s781_s30  ;;  %s436_s3 = sshll.u32 %s634_s17, 4  ;;  %s2272_s3 = int_to_ptr.vmem [resolvable:$true] %s436_s3 }
 0x191   : > { %s1343_s6 = scalar_lea.hbm %s384_s2, 16  ;;  %p2556_p1 = pmov %p2555_p0 }
 0x192   : > { %p1344_p12 = scmp.ne.s32.totalorder %s384_s2, %s1343_s6  ;;  %p1348_p3 = scmp.lt.u32.totalorder %s384_s2, %s2496_s1 }
 0x193   : > { %p1349_p6 = scmp.lt.u32.totalorder %s1882_s18, %s1343_s6  ;;  %p1351_p13 = scmp.lt.u32.totalorder %s1343_s6, %s384_s2 }
 0x194   : > { %p1345_p11 = pnand %p1344_p12, %p2556_p1 }
 0x195   : > { %p1350_p10 = por %p1349_p6, %p1348_p3 }
 0x196   : > { %p1346_p4 = pneg %p1345_p11 }
 0x197   : > { %p1352_p2 = por %p1351_p13, %p1350_p10 }
 0x199   : > { %p1353_p5 = pnand %p1352_p2, %p1346_p4 }
 0x19b   : > { %1356 = shalt.err (!%p1353_p5)  }
 0x19c   : > { %s1357_s4 = scalar_lea.vmem %s2203_s8, 16  ;;  %p2557_p7 = pmov %p2555_p0 }
 0x19d   : > { %p1358_p8 = scmp.ne.s32.totalorder %s2203_s8, %s1357_s4  ;;  %p1364_p12 = scmp.lt.s32.totalorder %s2203_s8, %s1855_s14 }
 0x19e   : > { %p1365_p1 = scmp.lt.s32.totalorder %s1893_s26, %s1357_s4 }
 0x19f   : > { %p1359_p9 = pnand %p1358_p8, %p2557_p7 }
 0x1a0   : > { %p1366_p11 = por %p1365_p1, %p1364_p12 }
 0x1a1   : > { %p1360_p0 = pneg %p1359_p9 }
 0x1a3   : > { %p1367_p3 = pnand %p1366_p11, %p1360_p0 }
 0x1a5   : > { %1370 = shalt.err (!%p1367_p3)  }
 0x1a6   : > { %p2558_p6 = pmov %p2557_p7  ;;  %p400_p13 = scmp.gt.s32.totalorder %s2236_s22, 0 }
 0x1a7   : > { %p783_p2 = scmp.lt.s32.totalorder %s2236_s22, 31  ;;  %s440_s17 = sadd.s32 5, %s2117_s25 }
 0x1a8   : > { %896 = dma.hbm_to_vmem [thread:$0]  (%p2558_p6), %s384_s2, 16, %s2203_s8, %s2171_s13 }
 0x1a9   : > { %p2559_p4 = pmov %p2558_p6  ;;  %s2670_s22 = smov (!%p400_p13, %s2236_s22), 0 }
 0x1aa   : > { %s2672_s22 = smov (!%p783_p2, %s2670_s22), 31 }
 0x1ab   : > { %s900_s5 = scalar_select %p2559_p4, [#allocation5], [#allocation56] }
 0x1ac   : > { %p2560_p10 = pmov %p2559_p4  ;;  %p2561_p5 = pmov %p2559_p4 }
 0x1ad   : > { %s788_s8 = sshll.u32 %s2672_s22, 4  ;;  %p2562_p9 = pmov %p2559_p4 }
 0x1ae   : > { %s2668_s27 = smov (!%p2560_p10, %s419_s27), 0  ;;  %s405_s2 = scalar_lea.hbm %s2496_s1, %s788_s8 }
 0x1af   : > { %s2266_s24 = sld [smem:[%s900_s5 + %s2668_s27]]  ;;  %s1371_s6 = scalar_lea.hbm %s405_s2, 16 }
 0x1b0   : > { %s2276_s30 = scalar_select %p2561_p5, [#allocation5], [#allocation57] }
 0x1b1   : > { %p1372_p7 = scmp.ne.s32.totalorder %s405_s2, %s1371_s6  ;;  %p1376_p1 = scmp.lt.u32.totalorder %s405_s2, %s2496_s1 }
 0x1b2   : > { %p1377_p11 = scmp.lt.u32.totalorder %s1882_s18, %s1371_s6  ;;  %p1379_p6 = scmp.lt.u32.totalorder %s1371_s6, %s405_s2 }
 0x1b3   : > { %p1373_p0 = pnand %p1372_p7, %p2562_p9 }
 0x1b4   : > { %p1378_p3 = por %p1377_p11, %p1376_p1 }
 0x1b5   : > { %p1374_p12 = pneg %p1373_p0 }
 0x1b6   : > { %p1380_p4 = por %p1379_p6, %p1378_p3 }
 0x1b8   : > { %p1381_p10 = pnand %p1380_p4, %p1374_p12 }
 0x1ba   : > { %1384 = shalt.err (!%p1381_p10)  }
 0x1bb   : > { %s1385_s22 = scalar_lea.vmem %s2270_s20, 16  ;;  %p2563_p2 = pmov %p2561_p5 }
 0x1bc   : > { %p1386_p13 = scmp.ne.s32.totalorder %s2270_s20, %s1385_s22  ;;  %p1392_p9 = scmp.lt.s32.totalorder %s2270_s20, %s1855_s14 }
 0x1bd   : > { %p1393_p0 = scmp.lt.s32.totalorder %s1893_s26, %s1385_s22 }
 0x1be   : > { %p1387_p5 = pnand %p1386_p13, %p2563_p2 }
 0x1bf   : > { %p1394_p8 = por %p1393_p0, %p1392_p9 }
 0x1c0   : > { %p1388_p7 = pneg %p1387_p5 }
 0x1c2   : > { %p1395_p1 = pnand %p1394_p8, %p1388_p7 }
 0x1c4   : > { %1398 = shalt.err (!%p1395_p1)  }
 0x1c5   : > { %p2564_p11 = pmov %p2563_p2  ;;  %p2565_p12 = scmp.gt.s32.totalorder %s2266_s24, 0 }
 0x1c6   : > { %p790_p3 = scmp.lt.s32.totalorder %s2266_s24, 31  ;;  %s639_s4 = scalar_lea.vmem %s2143_s15, 5 [#allocation2] }
 0x1c7   : > { %899 = dma.hbm_to_vmem [thread:$0]  (%p2564_p11), %s405_s2, 16, %s2270_s20, %s2171_s13 }
 0x1c8   : > { %s422_s11 = scalar_select %p2565_p12, %s2266_s24, 0 }
 0x1c9   : > { %p2566_p8 = pmov %p2563_p2  ;;  %s2310_s8 = sshll.u32 %s639_s4, 4  ;;  %s2344_s8 = int_to_ptr.vmem [resolvable:$true] %s2310_s8 }
 0x1ca   : > { %s2676_s11 = smov (!%p790_p3, %s422_s11), 31  ;;  %s461_s7 = sadd.s32 6, %s2117_s25 }
 0x1cb   : > { %s2674_s17 = smov (!%p2566_p8, %s440_s17), 0  ;;  %s795_s9 = sshll.u32 %s2676_s11, 4 }
 0x1cc   : > { %s2308_s5 = sld [smem:[%s2276_s30 + %s2674_s17]]  ;;  %s426_s19 = scalar_lea.hbm %s2496_s1, %s795_s9 }
 0x1cd   : > { %s644_s22 = scalar_lea.vmem %s2143_s15, 6 [#allocation2]  ;;  %s1399_s20 = scalar_lea.hbm %s426_s19, 16 }
 0x1ce   : > { %p1400_p6 = scmp.ne.s32.totalorder %s426_s19, %s1399_s20  ;;  %p2567_p4 = pmov %p2563_p2 }
 0x1cf   : > { %p1404_p2 = scmp.lt.u32.totalorder %s426_s19, %s2496_s1  ;;  %p1405_p5 = scmp.lt.u32.totalorder %s1882_s18, %s1399_s20 }
 0x1d0   : > { %p1401_p10 = pnand %p1400_p6, %p2567_p4  ;;  %p1407_p9 = scmp.lt.u32.totalorder %s1399_s20, %s426_s19 }
 0x1d1   : > { %p1406_p7 = por %p1405_p5, %p1404_p2 }
 0x1d2   : > { %p1402_p13 = pneg %p1401_p10 }
 0x1d3   : > { %p1408_p0 = por %p1407_p9, %p1406_p7 }
 0x1d5   : > { %p1409_p1 = pnand %p1408_p0, %p1402_p13 }
 0x1d7   : > { %1412 = shalt.err (!%p1409_p1)  }
 0x1d8   : > { %s1413_s30 = scalar_lea.vmem %s2272_s3, 16  ;;  %p2568_p12 = pmov %p2567_p4 }
 0x1d9   : > { %p1414_p11 = scmp.ne.s32.totalorder %s2272_s3, %s1413_s30  ;;  %p1420_p6 = scmp.lt.s32.totalorder %s2272_s3, %s1855_s14 }
 0x1da   : > { %p1421_p4 = scmp.lt.s32.totalorder %s1893_s26, %s1413_s30 }
 0x1db   : > { %p1415_p3 = pnand %p1414_p11, %p2568_p12 }
 0x1dc   : > { %p1422_p10 = por %p1421_p4, %p1420_p6 }
 0x1dd   : > { %p1416_p8 = pneg %p1415_p3 }
 0x1df   : > { %p1423_p2 = pnand %p1422_p10, %p1416_p8 }
 0x1e1   : > { %1426 = shalt.err (!%p1423_p2)  }
 0x1e2   : > { %p2569_p5 = pmov %p2568_p12  ;;  %p442_p9 = scmp.gt.s32.totalorder %s2308_s5, 0 }
 0x1e3   : > { %p797_p0 = scmp.lt.s32.totalorder %s2308_s5, 31  ;;  %s2346_s4 = sshll.u32 %s644_s22, 4  ;;  %s479_s4 = int_to_ptr.vmem [resolvable:$true] %s2346_s4 }
 0x1e4   : > { %902 = dma.hbm_to_vmem [thread:$0]  (%p2569_p5), %s426_s19, 16, %s2272_s3, %s2171_s13 }
 0x1e5   : > { %p2570_p13 = pmov %p2569_p5  ;;  %p2571_p7 = pmov %p2569_p5 }
 0x1e6   : > { %s2680_s5 = smov (!%p442_p9, %s2308_s5), 0  ;;  %p2572_p1 = pmov %p2569_p5 }
 0x1e7   : > { %s906_s17 = scalar_select %p2570_p13, [#allocation5], [#allocation58] }
 0x1e8   : > { %s2678_s7 = smov (!%p2571_p7, %s461_s7), 0  ;;  %s2682_s5 = smov (!%p797_p0, %s2680_s5), 31 }
 0x1e9   : > { %s2340_s11 = sld [smem:[%s906_s17 + %s2678_s7]]  ;;  %s802_s3 = sshll.u32 %s2682_s5, 4 }
 0x1ea   : > { %s2350_s9 = scalar_select %p2572_p1, [#allocation5], [#allocation59] }
 0x1eb   : > { %s482_s6 = sadd.s32 7, %s2117_s25  ;;  %s447_s20 = scalar_lea.hbm %s2496_s1, %s802_s3 }
 0x1ec   : > { %s1427_s24 = scalar_lea.hbm %s447_s20, 16  ;;  %p2573_p3 = pmov %p2572_p1 }
 0x1ed   : > { %p1428_p12 = scmp.ne.s32.totalorder %s447_s20, %s1427_s24  ;;  %p1432_p4 = scmp.lt.u32.totalorder %s447_s20, %s2496_s1 }
 0x1ee   : > { %p1433_p10 = scmp.lt.u32.totalorder %s1882_s18, %s1427_s24  ;;  %p1435_p5 = scmp.lt.u32.totalorder %s1427_s24, %s447_s20 }
 0x1ef   : > { %p1429_p8 = pnand %p1428_p12, %p2573_p3 }
 0x1f0   : > { %p1434_p2 = por %p1433_p10, %p1432_p4 }
 0x1f1   : > { %p1430_p6 = pneg %p1429_p8 }
 0x1f2   : > { %p1436_p13 = por %p1435_p5, %p1434_p2 }
 0x1f4   : > { %p1437_p7 = pnand %p1436_p13, %p1430_p6 }
 0x1f6   : > { %1440 = shalt.err (!%p1437_p7)  }
 0x1f7   : > { %s1441_s25 = scalar_lea.vmem %s2344_s8, 16  ;;  %p2574_p0 = pmov %p2572_p1 }
 0x1f8   : > { %p1442_p9 = scmp.ne.s32.totalorder %s2344_s8, %s1441_s25  ;;  %p1448_p3 = scmp.lt.s32.totalorder %s2344_s8, %s1855_s14 }
 0x1f9   : > { %p1449_p8 = scmp.lt.s32.totalorder %s1893_s26, %s1441_s25 }
 0x1fa   : > { %p1443_p1 = pnand %p1442_p9, %p2574_p0 }
 0x1fb   : > { %p1450_p11 = por %p1449_p8, %p1448_p3 }
 0x1fc   : > { %p1444_p12 = pneg %p1443_p1 }
 0x1fe   : > { %p1451_p4 = pnand %p1450_p11, %p1444_p12 }
 0x200   : > { %1454 = shalt.err (!%p1451_p4)  }
 0x201   : > { %p2575_p10 = pmov %p2574_p0  ;;  %p2576_p6 = scmp.gt.s32.totalorder %s2340_s11, 0 }
 0x202   : > { %p804_p2 = scmp.lt.s32.totalorder %s2340_s11, 31  ;;  %p2577_p5 = pmov %p2574_p0 }
 0x203   : > { %905 = dma.hbm_to_vmem [thread:$0]  (%p2575_p10), %s447_s20, 16, %s2344_s8, %s2171_s13 }
 0x204   : > { %s464_s5 = scalar_select %p2576_p6, %s2340_s11, 0 }
 0x205   : > { %s2684_s6 = smov (!%p2577_p5, %s482_s6), 0  ;;  %p2578_p13 = pmov %p2574_p0 }
 0x206   : > { %s2686_s5 = smov (!%p804_p2, %s464_s5), 31  ;;  %s2382_s22 = sld [smem:[%s2350_s9 + %s2684_s6]] }
 0x207   : > { %s809_s30 = sshll.u32 %s2686_s5, 4 }
 0x208   : > { %s468_s27 = scalar_lea.hbm %s2496_s1, %s809_s30 }
 0x209   : > { %s1455_s19 = scalar_lea.hbm %s468_s27, 16  ;;  %p1460_p0 = scmp.lt.u32.totalorder %s468_s27, %s2496_s1 }
 0x20a   : > { %p1456_p11 = scmp.ne.s32.totalorder %s468_s27, %s1455_s19  ;;  %p1461_p1 = scmp.lt.u32.totalorder %s1882_s18, %s1455_s19 }
 0x20b   : > { %p1463_p3 = scmp.lt.u32.totalorder %s1455_s19, %s468_s27 }
 0x20c   : > { %p1457_p7 = pnand %p1456_p11, %p2578_p13  ;;  %p1462_p12 = por %p1461_p1, %p1460_p0 }
 0x20e   : > { %p1458_p9 = pneg %p1457_p7  ;;  %p1464_p8 = por %p1463_p3, %p1462_p12 }
 0x210   : > { %p1465_p4 = pnand %p1464_p8, %p1458_p9 }
 0x212   : > { %1468 = shalt.err (!%p1465_p4)  }
 0x213   : > { %s1469_s11 = scalar_lea.vmem %s479_s4, 16  ;;  %p2579_p6 = pmov %p2577_p5 }
 0x214   : > { %p1470_p10 = scmp.ne.s32.totalorder %s479_s4, %s1469_s11  ;;  %p1476_p11 = scmp.lt.s32.totalorder %s479_s4, %s1855_s14 }
 0x215   : > { %p1477_p13 = scmp.lt.s32.totalorder %s1893_s26, %s1469_s11 }
 0x216   : > { %p1471_p2 = pnand %p1470_p10, %p2579_p6 }
 0x217   : > { %p1478_p7 = por %p1477_p13, %p1476_p11 }
 0x218   : > { %p1472_p5 = pneg %p1471_p2 }
 0x21a   : > { %p1479_p0 = pnand %p1478_p7, %p1472_p5 }
 0x21c   : > { %1482 = shalt.err (!%p1479_p0)  }
 0x21d   : > { %p2580_p1 = pmov %p2579_p6  ;;  %s649_s9 = scalar_lea.vmem %s2143_s15, 7 [#allocation2] }
 0x21e   : > { %p484_p9 = scmp.gt.s32.totalorder %s2382_s22, 0  ;;  %p811_p12 = scmp.lt.s32.totalorder %s2382_s22, 31 }
 0x21f   : > { %908 = dma.hbm_to_vmem [thread:$0]  (%p2580_p1), %s468_s27, 16, %s479_s4, %s2171_s13 }
 0x220   : > { %s499_s6 = sshll.u32 %s649_s9, 4  ;;  %s2688_s22 = smov (!%p484_p9, %s2382_s22), 0  ;;  %s500_s6 = int_to_ptr.vmem [resolvable:$true] %s499_s6 }
 0x221   : > { %s2690_s22 = smov (!%p811_p12, %s2688_s22), 31  ;;  %p2581_p8 = pmov %p2580_p1 }
 0x222   : > { %s816_s24 = sshll.u32 %s2690_s22, 4 }
 0x223   : > { %s489_s25 = scalar_lea.hbm %s2496_s1, %s816_s24 }
 0x224   : > { %s1483_s5 = scalar_lea.hbm %s489_s25, 16  ;;  %p1488_p6 = scmp.lt.u32.totalorder %s489_s25, %s2496_s1 }
 0x225   : > { %p1484_p3 = scmp.ne.s32.totalorder %s489_s25, %s1483_s5  ;;  %p1489_p2 = scmp.lt.u32.totalorder %s1882_s18, %s1483_s5 }
 0x226   : > { %p1491_p11 = scmp.lt.u32.totalorder %s1483_s5, %s489_s25 }
 0x227   : > { %p1485_p4 = pnand %p1484_p3, %p2581_p8  ;;  %p1490_p5 = por %p1489_p2, %p1488_p6 }
 0x229   : > { %p1486_p10 = pneg %p1485_p4  ;;  %p1492_p13 = por %p1491_p11, %p1490_p5 }
 0x22b   : > { %p1493_p7 = pnand %p1492_p13, %p1486_p10 }
 0x22d   : > { %1496 = shalt.err (!%p1493_p7)  }
 0x22e   : > { %s1497_s15 = scalar_lea.vmem %s500_s6, 16  ;;  %p1504_p3 = scmp.lt.s32.totalorder %s500_s6, %s1855_s14 }
 0x22f   : > { %p1498_p0 = scmp.ne.s32.totalorder %s500_s6, %s1497_s15  ;;  %p1505_p8 = scmp.lt.s32.totalorder %s1893_s26, %s1497_s15 }
 0x231   : > { %p1499_p9 = pnand %p1498_p0, %p2580_p1  ;;  %p1506_p4 = por %p1505_p8, %p1504_p3 }
 0x233   : > { %p1500_p12 = pneg %p1499_p9 }
 0x235   : > { %p1507_p2 = pnand %p1506_p4, %p1500_p12 }
 0x237   : > { %1510 = shalt.err (!%p1507_p2)  }
 0x238   : > { %p2582_p6 = pmov %p2580_p1  ;;  %s151_s18 = scalar_lea.vmem [#allocation9], %s1839_s12 }
 0x239   : > { %s503_s4 = scalar_lea.sflag [#allocation3], %s2610_s21 }
 0x23a   : > { %911 = dma.hbm_to_vmem [thread:$0]  (%p2582_p6), %s489_s25, 16, %s500_s6, %s2171_s13 }
 0x23b   : > { %1589 = dma.done.wait %s503_s4, 128 }
 0x23c   : > { %1590 = vsyncadd %s503_s4, 4294967168  ;;  %s818_s14 = sshll.u32 %s2610_s21, 3  ;;  %s2583_s26 = sshll.u32 %s1621_s0, 1 }
 0x23d   : > { %s539_s22 = sadd.s32 %s1625_s28, %s2583_s26  ;;  %s543_s27 = sshll.u32 %s151_s18, 4  ;;  %s2433_s27 = int_to_ptr.vmem [resolvable:$true] %s543_s27 }
 0x23e   : > { %s821_s3 = sshll.u32 %s539_s22, 7  ;;  %s522_s29 = scalar_lea.vmem [#allocation2], %s818_s14 }
 0x23f   : > { %v523_v0 = vld [vmem:[%s522_s29] sm:$0xff]  ;;  %s2584_s19 = scalar_lea.vmem [#allocation6], %s1828_s10  ;;  %s2585_s8 = sld [smem:[#allocation77_spill]] }
 0x240   : > { %v524_v1 = vld [vmem:[%s2584_s19] sm:$0xff]  ;;  %s2586_s0 = sand.u32 1, %s1601_s23   ;;  %s1511_s21 = scalar_lea.vmem %s2433_s27, 128 }
 0x241   : > { %v525_v2 = vadd.f32 %v524_v1, %v523_v0  ;;  %s528_s28 = scalar_lea.sflag [#allocation8], %s2586_s0  ;;  %p1512_p10 = scmp.ne.s32.totalorder %s2433_s27, %s1511_s21 }
 0x242   : > { %p2587_p5 = scmp.ne.s32.totalorder %s2527_s16, 0  ;;  %s1649_s10 = smov [#allocation9]  }
 0x243   : > { %526 = vst [vmem:[%s151_s18] sm:$0xff] %v525_v2  ;;  %s1515_s11 = sshll.u32 %s1649_s10, 4  ;;  %s1516_s11 = int_to_ptr.vmem [resolvable:$false] %s1515_s11 }
 0x244   : > { %p1513_p11 = pnand %p1512_p10, %p2587_p5  ;;  %s1517_s9 = scalar_lea.vmem %s1516_s11, 256 }
 0x245   : > { %s2431_s20 = scalar_lea.hbm %s2585_s8, %s821_s3  ;;  %p1518_p7 = scmp.lt.s32.totalorder %s2433_s27, %s1516_s11 }
 0x246   : > { %p1514_p13 = pneg %p1513_p11  ;;  %p1519_p0 = scmp.lt.s32.totalorder %s1517_s9, %s1511_s21 }
 0x248   : > { %p1520_p1 = por %p1519_p0, %p1518_p7 }
 0x24a   : > { %p1521_p9 = pnand %p1520_p1, %p1514_p13 }
 0x24c   : > { %1524 = shalt.err (!%p1521_p9)
}
 0x24d   : > { %s1525_s6 = scalar_lea.hbm %s2431_s20, 128  ;;  %s1529_s2 = scalar_lea.hbm %s2585_s8, 512 }
 0x24e   : > { %p1526_p12 = scmp.ne.s32.totalorder %s2431_s20, %s1525_s6  ;;  %p1530_p4 = scmp.lt.u32.totalorder %s2431_s20, %s2585_s8 }
 0x24f   : > { %p1531_p2 = scmp.lt.u32.totalorder %s1529_s2, %s1525_s6  ;;  %p1533_p10 = scmp.lt.u32.totalorder %s1525_s6, %s2431_s20 }
 0x250   : > { %p1527_p3 = pnand %p1526_p12, %p2587_p5 }
 0x251   : > { %p1532_p6 = por %p1531_p2, %p1530_p4 }
 0x252   : > { %p1528_p8 = pneg %p1527_p3 }
 0x253   : > { %p1534_p11 = por %p1533_p10, %p1532_p6 }
 0x255   : > { %p1535_p13 = pnand %p1534_p11, %p1528_p8 }
 0x257   : > { %1538 = shalt.err (!%p1535_p13)
}
 0x258   : > { %912 = dma.vmem_to_hbm [thread:$0]  (%p2587_p5), %s2433_s27, 128, %s2431_s20, %s528_s28  }
 0x259 PF: > { %s2588_s30 = sld [smem:[#allocation70_spill]]  ;;  %s2589_s17 = sld [smem:[#allocation64_spill]] }
 0x25a   : > { %s2590_s15 = sld [smem:[#allocation75_spill]] }
 0x25f   : > { %p925_p7 = scmp.ge.s32.totalorder %s2588_s30, 2  ;;  %s555_s18 = sand.u32 1, %s2589_s17  }
 0x260   : > { %p2591_p0 = scmp.ne.s32.totalorder %s2590_s15, 0  ;;  %s556_s4 = scalar_lea.sflag [#allocation8], %s555_s18 }
 0x262   : > { %p919_p1 = pnand %p925_p7, %p2591_p0 }
 0x264   : > { %1592 = dma.done.wait (!%p919_p1), %s556_s4, 128  }
 0x265   : > { %1594 = vsyncadd (!%p919_p1), %s556_s4, 4294967168  ;;  %s23_s4 = sadd.s32 1, %s2588_s30   ;;  %s2592_s14 = sld [smem:[#allocation65_spill]] }
 0x266   : > { %p20_p9 = scmp.ge.s32.totalorder %s23_s4, 6   ;;  %s2593_s24 = sld [smem:[#allocation74_spill]] }
 0x267   : > { %s2594_s25 = sld [smem:[#allocation66_spill]]  ;;  %s2595_s26 = sld [smem:[#allocation67_spill]] }
 0x268   : > { %s2596_s27 = sld [smem:[#allocation73_spill]]  ;;  %s2597_s0 = sld [smem:[#allocation68_spill]] }
 0x269   : > { %s2598_s28 = sld [smem:[#allocation69_spill]]  ;;  %s2599_s29 = sld [smem:[#allocation71_spill]] }
 0x26a   : > { %s2600_s30 = sld [smem:[#allocation72_spill]]  ;;  %s2601_s22 = smov %s1601_s23 }
 0x26b   : > { %s2602_s23 = smov %s2592_s14  ;;  %22 = sbr.rel (!%p20_p9) target bundleno = 22 (0x16), region = 176 }
 0x272   :  { %561 = vsyncpa [#allocation7], 1 }
 0x273   :  { %563 = vsyncpa [#allocation7 + $0x1], 1 }
 0x274   :  { %564 = vsyncpa [#allocation8], 1 }
 0x275   :  { %566 = vsyncpa [#allocation8 + $0x1], 1 }
 0x276   :  { %567 = vsyncmov [#allocation3] }
 0x279   :  { %s568_s16 = vpop.sfrf %567 }
 0x27a   :  { %p824_p5 = scmp.ne.s32.totalorder %s568_s16, 0 }
 0x27c   :  { %572 = shalt.err (%p824_p5)  }
 0x27d   :  { %574 = vsyncmov [#allocation3 + $0x1] }
 0x280   :  { %s575_s3 = vpop.sfrf %574 }
 0x281   :  { %p825_p12 = scmp.ne.s32.totalorder %s575_s3, 0 }
 0x283   :  { %579 = shalt.err (%p825_p12)  }

</bundles_post_ra>
